<compile_context>
chip_gen: v6e
topology: v6e:2x2x1
jax: 0.10.0
libtpu: 0.0.40
codegen_flags: <defaults>
</compile_context>

<pallas_src>
import functools
import math

import jax
import jax.numpy as jnp
from jax.experimental import pallas as pl
from jax.experimental.pallas import tpu as pltpu


# ----------------------------------------------------------------------------------
# helpers
# ----------------------------------------------------------------------------------
def _round_up(x, m):
    return (x + m - 1) // m * m


def _pick_tn(cout, k_eff):
    """Output-channel tile for the conv kernel (divides cout, caps weight-block VMEM)."""
    if cout <= 256:
        tn = cout
    elif cout % 256 == 0:
        tn = 256
    elif cout % 128 == 0:
        tn = 128
    else:
        tn = cout
    while tn > 128 and cout % (tn // 2) == 0 and k_eff * tn * 4 > (6 << 20):
        tn //= 2
    return tn


# ----------------------------------------------------------------------------------
# Pallas kernels
# ----------------------------------------------------------------------------------
def _matmul_kernel(a_ref, b_ref, bias_ref, o_ref, acc_ref, *, activation):
    @pl.when(pl.program_id(2) == 0)
    def _():
        acc_ref[...] = jnp.zeros_like(acc_ref)

    acc_ref[...] += jnp.dot(a_ref[...], b_ref[...],
                            preferred_element_type=jnp.float32)

    @pl.when(pl.program_id(2) == pl.num_programs(2) - 1)
    def _():
        y = acc_ref[...] + bias_ref[...]          # (tm, tn) + (1, tn)
        if activation == "silu":
            y = y * jax.nn.sigmoid(y)
        o_ref[...] = y.astype(o_ref.dtype)


def matmul_bias(a, b, bias, activation=None):
    """f32 (M,K) @ (K,N) + bias (N,) [-> optional SiLU], tiled on the MXU."""
    M, K = a.shape
    K2, N = b.shape
    assert K == K2
    Kp = _round_up(K, 128)
    Np = _round_up(N, 128)
    if M > 256:
        tm, Mp = 256, _round_up(M, 256)
    else:
        tm = Mp = max(8, _round_up(M, 8))
    tk = Kp if Kp <= 512 else next(t for t in (512, 384, 256, 128) if Kp % t == 0)
    tn = Np if Np <= 256 else (256 if Np % 256 == 0 else 128)

    a_p = a if (M == Mp and K == Kp) else jnp.pad(a, ((0, Mp - M), (0, Kp - K)))
    b_p = b if (K == Kp and N == Np) else jnp.pad(b, ((0, Kp - K), (0, Np - N)))
    bias_p = bias if N == Np else jnp.pad(bias, (0, Np - N))
    bias_p = bias_p.reshape(1, Np).astype(jnp.float32)

    kern = functools.partial(_matmul_kernel, activation=activation)
    out = pl.pallas_call(
        kern,
        out_shape=jax.ShapeDtypeStruct((Mp, Np), jnp.float32),
        grid_spec=pltpu.PrefetchScalarGridSpec(
            num_scalar_prefetch=0,
            grid=(Mp // tm, Np // tn, Kp // tk),
            in_specs=[pl.BlockSpec((tm, tk), lambda i, j, k: (i, k)),
                      pl.BlockSpec((tk, tn), lambda i, j, k: (k, j)),
                      pl.BlockSpec((1, tn), lambda i, j, k: (0, j))],
            out_specs=pl.BlockSpec((tm, tn), lambda i, j, k: (i, j)),
            scratch_shapes=[pltpu.VMEM((tm, tn), jnp.float32)]),
        compiler_params=pltpu.CompilerParams(
            dimension_semantics=("parallel", "parallel", "arbitrary"),
            vmem_limit_bytes=40 * 1024 * 1024),
    )(a_p, b_p, bias_p)
    if Mp != M or Np != N:
        out = out[:M, :N]
    return out


def _conv_kernel(*refs, W, HW, T, has_emb, has_res):
    """3x3 (T=9) or 1x1 (T=1) stride-1 conv on a flat-NHWC, row-padded input block.
    Fuses bias + optional per-batch (emb) add + optional residual add."""
    x_ref, w_ref, b_ref = refs[0], refs[1], refs[2]
    idx = 3
    e_ref = None
    r_ref = None
    if has_emb:
        e_ref = refs[idx]
        idx += 1
    if has_res:
        r_ref = refs[idx]
        idx += 1
    o_ref = refs[idx]
    tn = o_ref.shape[2]

    if T == 1:
        acc = jnp.dot(x_ref[0], w_ref[0], preferred_element_type=jnp.float32)
    else:
        pcol = jax.lax.broadcasted_iota(jnp.int32, (HW, 1), 0) % W
        ml = (pcol > 0).astype(jnp.float32)          # kills wrapped left-pad reads
        mr = (pcol < W - 1).astype(jnp.float32)      # kills wrapped right-pad reads
        acc = jnp.zeros((HW, tn), jnp.float32)
        for t in range(9):
            dy, dx = t // 3, t % 3
            a = x_ref[0, pl.ds(dy * W + dx, HW), :]  # (HW, Cin) shifted window
            if dx == 0:
                a = a * ml
            elif dx == 2:
                a = a * mr
            acc = acc + jnp.dot(a, w_ref[t], preferred_element_type=jnp.float32)

    y = acc + b_ref[...]                             # (HW, tn) + (1, tn)
    if has_emb:
        y = y + e_ref[...]
    if has_res:
        y = y + r_ref[0]
    o_ref[0] = y


def conv2d_s1(x_flat, H, W, w, b, *, emb=None, residual=None):
    """Stride-1 conv (k = 1 or 3, 'same' padding) on flat-NHWC input.
    x_flat: (B, H*W, Cin);  w: (kh*kw, Cin, Cout);  b: (Cout,).
    Optionally fuses `emb` (B, Cout) and `residual` (B, H*W, Cout) adds.
    Returns (B, H*W, Cout)."""
    B, HW, C = x_flat.shape
    T, C2, Cout = w.shape
    assert C2 == C and HW == H * W and T in (1, 9)
    # pad one zero row above/below + 1 corner element each side, flattened:
    xin = jnp.pad(x_flat, ((0, 0), (W + 1, W + 1), (0, 0))) if T == 9 else x_flat
    L = xin.shape[1]
    tn = _pick_tn(Cout, T * C)
    n_tiles = Cout // tn

    in_specs = [pl.BlockSpec((1, L, C), lambda i, j: (i, 0, 0)),
                pl.BlockSpec((T, C, tn), lambda i, j: (0, 0, j)),
                pl.BlockSpec((1, tn), lambda i, j: (0, j))]
    args = [xin, w, b.reshape(1, Cout)]
    if emb is not None:
        in_specs.append(pl.BlockSpec((1, tn), lambda i, j: (i, j)))
        args.append(emb)
    if residual is not None:
        in_specs.append(pl.BlockSpec((1, HW, tn), lambda i, j: (i, 0, j)))
        args.append(residual)

    kern = functools.partial(_conv_kernel, W=W, HW=HW, T=T,
                             has_emb=emb is not None, has_res=residual is not None)
    return pl.pallas_call(
        kern,
        out_shape=jax.ShapeDtypeStruct((B, HW, Cout), jnp.float32),
        grid=(B, n_tiles),
        in_specs=in_specs,
        out_specs=pl.BlockSpec((1, HW, tn), lambda i, j: (i, 0, j)),
        compiler_params=pltpu.CompilerParams(
            dimension_semantics=("parallel", "parallel"),
            vmem_limit_bytes=40 * 1024 * 1024),
    )(*args)


def conv2d_down(x_flat, H, W, w, b):
    """3x3 stride-2 pad-1 conv (Downsample).  Small im2col + fused-bias matmul."""
    B, HW, C = x_flat.shape
    Cout = w.shape[2]
    x = x_flat.reshape(B, H, W, C)
    xp = jnp.pad(x, ((0, 0), (1, 1), (1, 1), (0, 0)))
    Ho = (H - 1) // 2 + 1
    Wo = (W - 1) // 2 + 1
    cols = []
    for dy in range(3):
        for dx in range(3):
            cols.append(jax.lax.slice(
                xp, (0, dy, dx, 0),
                (B, dy + 2 * (Ho - 1) + 1, dx + 2 * (Wo - 1) + 1, C),
                (1, 2, 2, 1)))
    patches = jnp.stack(cols, axis=3).reshape(B * Ho * Wo, 9 * C)
    y = matmul_bias(patches, w.reshape(9 * C, Cout), b)
    return y.reshape(B, Ho * Wo, Cout), Ho, Wo


def _gn_silu_kernel(x_ref, g_ref, b_ref, o_ref, *, eps, apply_silu):
    x = x_ref[...]                                   # (1, HW, C)
    mean = jnp.mean(x)
    var = jnp.mean(jnp.square(x - mean))
    xn = (x - mean) * jax.lax.rsqrt(var + eps)
    y = xn * g_ref[...][None] + b_ref[...][None]     # (1, C) broadcasts over HW
    if apply_silu:
        y = y * jax.nn.sigmoid(y)
    o_ref[...] = y


def groupnorm1(x, gamma, beta, apply_silu=False, eps=1e-5):
    """GroupNorm(num_groups=1) (+ optional fused SiLU) on flat-NHWC x: (B, HW, C)."""
    B, HW, C = x.shape
    g = gamma.reshape(1, C).astype(jnp.float32)
    bt = beta.reshape(1, C).astype(jnp.float32)
    kern = functools.partial(_gn_silu_kernel, eps=eps, apply_silu=apply_silu)
    return pl.pallas_call(
        kern,
        out_shape=jax.ShapeDtypeStruct((B, HW, C), jnp.float32),
        grid=(B,),
        in_specs=[pl.BlockSpec((1, HW, C), lambda i: (i, 0, 0)),
                  pl.BlockSpec((1, C), lambda i: (0, 0)),
                  pl.BlockSpec((1, C), lambda i: (0, 0))],
        out_specs=pl.BlockSpec((1, HW, C), lambda i: (i, 0, 0)),
        compiler_params=pltpu.CompilerParams(dimension_semantics=("parallel",)),
    )(x, g, bt)


def _silu_kernel(x_ref, o_ref):
    x = x_ref[...]
    o_ref[...] = x * jax.nn.sigmoid(x)


def pallas_silu(x):
    return pl.pallas_call(
        _silu_kernel, out_shape=jax.ShapeDtypeStruct(x.shape, x.dtype))(x)


def _attn_kernel(q_ref, k_ref, v_ref, o_ref, *, scale):
    q = q_ref[...] * scale                           # (BH, T, ch)
    k = k_ref[...] * scale
    v = v_ref[...]
    w = jnp.einsum('btc,bsc->bts', q, k, preferred_element_type=jnp.float32)
    w = w - jnp.max(w, axis=-1, keepdims=True)
    e = jnp.exp(w)
    p = e / jnp.sum(e, axis=-1, keepdims=True)
    o_ref[...] = jnp.einsum('bts,bsc->btc', p, v, preferred_element_type=jnp.float32)


def pallas_attention(q, k, v, scale):
    """q,k,v: (B*heads, T, ch) -> (B*heads, T, ch); all heads in one call."""
    kern = functools.partial(_attn_kernel, scale=scale)
    return pl.pallas_call(
        kern, out_shape=jax.ShapeDtypeStruct(q.shape, jnp.float32))(q, k, v)


def _render_kernel(x_ref, mean_ref, std_ref, nopix_ref, o_ref):
    x = x_ref[...]                                   # (1, HW, 4) normalized rgbd
    mean = mean_ref[...][None]                       # (1, 1, 4)
    std = std_ref[...][None]
    nop = nopix_ref[...][None]
    denorm = x * std + mean
    mask = denorm[:, :, 3:4] > 0.0
    renorm = (denorm - mean) / std
    o_ref[...] = jnp.where(mask, renorm, nop)


# ----------------------------------------------------------------------------------
# Deterministic parameter init (shapes follow UNetModel.__init__), pre-laid-out:
#   conv weight: (kh*kw, Cin, Cout)   linear weight: (In, Out)
# ----------------------------------------------------------------------------------
class KeyGen:
    def __init__(self, key):
        self.key = key

    def __call__(self):
        self.key, sub = jax.random.split(self.key)
        return sub


def init_conv(kg, o, c, k):
    return {"w": 0.02 * jax.random.normal(kg(), (k * k, c, o), jnp.float32),
            "b": jnp.zeros((o,), jnp.float32)}


def init_linear(kg, o, i):
    return {"w": 0.02 * jax.random.normal(kg(), (i, o), jnp.float32),
            "b": jnp.zeros((o,), jnp.float32)}


def init_gn(c):
    return {"g": jnp.ones((c,), jnp.float32), "b": jnp.zeros((c,), jnp.float32)}


def init_resblock(kg, ch, emb_dim, out_ch):
    p = {"norm1": init_gn(ch),
         "conv1": init_conv(kg, out_ch, ch, 3),
         "emb": init_linear(kg, out_ch, emb_dim),
         "norm2": init_gn(out_ch),
         "conv2": init_conv(kg, out_ch, out_ch, 3)}
    if out_ch != ch:
        p["skip"] = init_conv(kg, out_ch, ch, 1)
    return p


def init_attn(kg, ch):
    return {"norm": init_gn(ch),
            "qkv": init_conv(kg, 3 * ch, ch, 1),
            "proj": init_conv(kg, ch, ch, 1)}


def init_unet(kg, in_ch=8, out_ch=4, mc=128, mults=(1, 2, 3, 3, 4, 4),
              nrb=2, attn_res=(4, 8, 16, 32), nhc=32):
    ted = mc * 4
    params = {"time1": init_linear(kg, ted, mc),
              "time2": init_linear(kg, ted, ted)}
    input_blocks = [[("conv", init_conv(kg, mc, in_ch, 3))]]
    ch, chans, ds = mc, [mc], 1
    for level, mult in enumerate(mults):
        for _ in range(nrb):
            layers = [("res", init_resblock(kg, ch, ted, mult * mc))]
            ch = mult * mc
            if ds in attn_res:
                layers.append(("attn", init_attn(kg, ch), ch // nhc))
            input_blocks.append(layers)
            chans.append(ch)
        if level != len(mults) - 1:
            input_blocks.append([("down", init_conv(kg, ch, ch, 3))])
            chans.append(ch)
            ds *= 2
    params["input_blocks"] = input_blocks
    params["middle"] = [("res", init_resblock(kg, ch, ted, ch)),
                        ("attn", init_attn(kg, ch), ch // nhc),
                        ("res", init_resblock(kg, ch, ted, ch))]
    output_blocks = []
    for level, mult in list(enumerate(mults))[::-1]:
        for i in range(nrb + 1):
            ich = chans.pop()
            layers = [("res", init_resblock(kg, ch + ich, ted, mult * mc))]
            ch = mult * mc
            if ds in attn_res:
                layers.append(("attn", init_attn(kg, ch), ch // nhc))
            if level and i == nrb:
                layers.append(("up", init_conv(kg, ch, ch, 3)))
                ds //= 2
            output_blocks.append(layers)
    params["output_blocks"] = output_blocks
    params["out_norm"] = init_gn(ch)
    params["out_conv"] = init_conv(kg, out_ch, ch, 3)
    params["model_channels"] = mc
    return params


# ----------------------------------------------------------------------------------
# UNet forward (OpenAI/LDM UNetModel with GN converted to num_groups=1), flat NHWC
# ----------------------------------------------------------------------------------
def linear(x, w, b, activation=None):
    return matmul_bias(x, w, b, activation=activation)


def upsample2x(x_flat, H, W):
    B, HW, C = x_flat.shape
    x = x_flat.reshape(B, H, W, C)
    x = jnp.repeat(jnp.repeat(x, 2, axis=1), 2, axis=2)
    return x.reshape(B, 4 * HW, C)


def resblock_forward(p, x_flat, H, W, emb_silu):
    h = groupnorm1(x_flat, p["norm1"]["g"], p["norm1"]["b"], apply_silu=True)
    e = linear(emb_silu, p["emb"]["w"], p["emb"]["b"])            # (B, out_ch)
    h = conv2d_s1(h, H, W, p["conv1"]["w"], p["conv1"]["b"], emb=e)   # fused emb add
    h = groupnorm1(h, p["norm2"]["g"], p["norm2"]["b"], apply_silu=True)
    if "skip" in p:
        skip = conv2d_s1(x_flat, H, W, p["skip"]["w"], p["skip"]["b"])
    else:
        skip = x_flat
    return conv2d_s1(h, H, W, p["conv2"]["w"], p["conv2"]["b"], residual=skip)


def attn_forward(p, x_flat, H, W, n_heads):
    B, HW, C = x_flat.shape
    h = groupnorm1(x_flat, p["norm"]["g"], p["norm"]["b"], apply_silu=False)
    qkv = conv2d_s1(h, H, W, p["qkv"]["w"], p["qkv"]["b"])        # (B, HW, 3C)
    ch = C // n_heads
    qkv5 = qkv.reshape(B, HW, n_heads, 3, ch)                     # legacy head split
    if HW == 1:                                                   # softmax over 1 key
        a = qkv5[:, :, :, 2, :].reshape(B, HW, C)
    else:
        q = qkv5[:, :, :, 0, :].transpose(0, 2, 1, 3).reshape(B * n_heads, HW, ch)
        k = qkv5[:, :, :, 1, :].transpose(0, 2, 1, 3).reshape(B * n_heads, HW, ch)
        v = qkv5[:, :, :, 2, :].transpose(0, 2, 1, 3).reshape(B * n_heads, HW, ch)
        scale = 1.0 / math.sqrt(math.sqrt(ch))
        a = pallas_attention(q, k, v, scale)
        a = a.reshape(B, n_heads, HW, ch).transpose(0, 2, 1, 3).reshape(B, HW, C)
    return conv2d_s1(a, H, W, p["proj"]["w"], p["proj"]["b"], residual=x_flat)


def apply_block(layers, h, H, W, emb_silu):
    for layer in layers:
        kind = layer[0]
        if kind == "conv":
            h = conv2d_s1(h, H, W, layer[1]["w"], layer[1]["b"])
        elif kind == "res":
            h = resblock_forward(layer[1], h, H, W, emb_silu)
        elif kind == "attn":
            h = attn_forward(layer[1], h, H, W, layer[2])
        elif kind == "down":
            h, H, W = conv2d_down(h, H, W, layer[1]["w"], layer[1]["b"])
        elif kind == "up":
            h = upsample2x(h, H, W)
            H, W = 2 * H, 2 * W
            h = conv2d_s1(h, H, W, layer[1]["w"], layer[1]["b"])
    return h, H, W


def unet_forward(params, x_flat, H, W, t):
    mc = params["model_channels"]
    half = mc // 2
    freqs = jnp.exp(-math.log(10000.0) *
                    jnp.arange(half, dtype=jnp.float32) / half)
    args = t.astype(jnp.float32)[:, None] * freqs[None]
    temb = jnp.concatenate([jnp.cos(args), jnp.sin(args)], axis=-1)   # (B, mc)
    emb = linear(temb, params["time1"]["w"], params["time1"]["b"], activation="silu")
    emb = linear(emb, params["time2"]["w"], params["time2"]["b"])
    emb_silu = pallas_silu(emb)     # SiLU of emb_layers, shared by every resblock

    hs = []
    h = x_flat.astype(jnp.float32)
    curH, curW = H, W
    for block in params["input_blocks"]:
        h, curH, curW = apply_block(block, h, curH, curW, emb_silu)
        hs.append(h)
    h, curH, curW = apply_block(params["middle"], h, curH, curW, emb_silu)
    for block in params["output_blocks"]:
        h = jnp.concatenate([h, hs.pop()], axis=-1)
        h, curH, curW = apply_block(block, h, curH, curW, emb_silu)
    h = groupnorm1(h, params["out_norm"]["g"], params["out_norm"]["b"],
                   apply_silu=True)
    return conv2d_s1(h, curH, curW, params["out_conv"]["w"], params["out_conv"]["b"])


# ----------------------------------------------------------------------------------
# Model.forward
# ----------------------------------------------------------------------------------
def render_views_standin(rgbd_prev, mean_std, no_pixel):
    # TODO(synk): Render.meshing_many / render_many (triangle-mesh rasterization of the
    # previous RGBD views into the target camera) has no clean Pallas equivalent; this
    # stand-in uses the last previous view as the "rendered" image and its denormalized
    # depth > 0 as the rendered mask, keeping the denorm/renorm/no_pixel masking
    # semantics in a Pallas kernel.
    x = rgbd_prev[:, -1]                              # (B, 4, H, W)
    B, C, H, W = x.shape
    xf = x.reshape(B, C, H * W).transpose(0, 2, 1)    # (B, HW, 4)  flat NHWC
    mean = mean_std[:, 0].reshape(1, C).astype(jnp.float32)
    std = mean_std[:, 1].reshape(1, C).astype(jnp.float32)
    nop = no_pixel.reshape(1, C).astype(jnp.float32)
    return pl.pallas_call(
        _render_kernel,
        out_shape=jax.ShapeDtypeStruct((B, H * W, C), jnp.float32),
        grid=(B,),
        in_specs=[pl.BlockSpec((1, H * W, C), lambda i: (i, 0, 0)),
                  pl.BlockSpec((1, C), lambda i: (0, 0)),
                  pl.BlockSpec((1, C), lambda i: (0, 0)),
                  pl.BlockSpec((1, C), lambda i: (0, 0))],
        out_specs=pl.BlockSpec((1, H * W, C), lambda i: (i, 0, 0)),
        compiler_params=pltpu.CompilerParams(dimension_semantics=("parallel",)),
    )(xf, mean, std, nop)                             # (B, HW, 4)


def model_forward(params, rgbd, cam, t, mean_std):
    """rgbd: (B, N, 4, H, W); cam = (camint (B,N,3,3), camext (B,N,3,4)); t: (B,);
    mean_std: (4, 2).  Returns (B, 4, H, W) NCHW like the PyTorch module."""
    B, N = rgbd.shape[:2]
    assert N >= 2, "at least one previous view is provided"
    camint, camext = cam   # consumed by the rasterizer (stand-in above); interface kept
    del camint, camext
    H, W = rgbd.shape[-2], rgbd.shape[-1]
    rendered = render_views_standin(rgbd[:, :-1], mean_std, params["no_pixel"])
    curr = rgbd[:, -1].reshape(B, 4, H * W).transpose(0, 2, 1)        # (B, HW, 4)
    unet_in = jnp.concatenate([rendered, curr], axis=-1)              # (B, HW, 8)
    out_flat = unet_forward(params["unet"], unet_in, H, W, t)         # (B, HW, 4)
    return out_flat.transpose(0, 2, 1).reshape(B, 4, H, W)


# ----------------------------------------------------------------------------------
if __name__ == "__main__":
    key = jax.random.PRNGKey(0)
    kg = KeyGen(key)

    img_size = 32        # must be divisible by 2**(len(channel_mult)-1) = 32
    B, N = 1, 2

    params = {"unet": init_unet(kg),
              "no_pixel": jnp.zeros((4,), jnp.float32)}   # nn.Parameter(torch.zeros(4))

    k1, k2, k3, k4 = jax.random.split(jax.random.PRNGKey(0), 4)
    rgbd = jax.random.normal(k1, (B, N, 4, img_size, img_size), jnp.float32)
    camint = jax.random.normal(k2, (B, N, 3, 3), jnp.float32)
    camext = jax.random.normal(k3, (B, N, 3, 4), jnp.float32)
    t = jnp.array([37] * B, dtype=jnp.int32)
    mean_std = jnp.stack(
        [0.1 * jax.random.normal(k4, (4,), jnp.float32),                  # mean
         jnp.abs(jax.random.normal(jax.random.PRNGKey(7), (4,))) + 0.5],  # std
        axis=1)                                                           # (4, 2)

    out = model_forward(params, rgbd, (camint, camext), t, mean_std)
    out = jax.block_until_ready(out)
    assert out.shape == (B, 4, img_size, img_size)
    assert out.dtype == jnp.float32
    assert bool(jnp.all(jnp.isfinite(out)))
    print("KERNEL_OK")
</pallas_src>

<mosaic_0001>
module attributes {stable_mosaic.version = 11 : i64} {
  func.func @_render_kernel(%arg0: i32, %arg1: memref<1x1024x4xf32, #tpu.memory_space<vmem>>, %arg2: memref<1x4xf32, #tpu.memory_space<vmem>>, %arg3: memref<1x4xf32, #tpu.memory_space<vmem>>, %arg4: memref<1x4xf32, #tpu.memory_space<vmem>>, %arg5: memref<1x1024x4xf32, #tpu.memory_space<vmem>>) attributes {dimension_semantics = [#tpu.dimension_semantics<parallel>], iteration_bounds = array<i64: 1>, scalar_prefetch = 0 : i64, scratch_operands = 0 : i64, tpu.core_type = #tpu.core_type<tc>, window_params = [{transform_indices = @transform_0, window_bounds = array<i64: 1, 1024, 4>}, {pipeline_mode = #tpu.pipeline_mode<synchronous>, transform_indices = @transform_1, window_bounds = array<i64: 1, 4>}, {pipeline_mode = #tpu.pipeline_mode<synchronous>, transform_indices = @transform_2, window_bounds = array<i64: 1, 4>}, {pipeline_mode = #tpu.pipeline_mode<synchronous>, transform_indices = @transform_3, window_bounds = array<i64: 1, 4>}, {transform_indices = @transform_4, window_bounds = array<i64: 1, 1024, 4>}]} {
    %c0 = arith.constant 0 : index
    %c0_0 = arith.constant 0 : index
    %c0_1 = arith.constant 0 : index
    %0 = vector.load %arg1[%c0, %c0_0, %c0_1] : memref<1x1024x4xf32, #tpu.memory_space<vmem>>, vector<1x1024x4xf32>
    %c0_2 = arith.constant 0 : index
    %c0_3 = arith.constant 0 : index
    %1 = vector.load %arg2[%c0_2, %c0_3] : memref<1x4xf32, #tpu.memory_space<vmem>>, vector<1x4xf32>
    %2 = vector.shape_cast %1 : vector<1x4xf32> to vector<1x1x4xf32>
    %c0_4 = arith.constant 0 : index
    %c0_5 = arith.constant 0 : index
    %3 = vector.load %arg3[%c0_4, %c0_5] : memref<1x4xf32, #tpu.memory_space<vmem>>, vector<1x4xf32>
    %4 = vector.shape_cast %3 : vector<1x4xf32> to vector<1x1x4xf32>
    %c0_6 = arith.constant 0 : index
    %c0_7 = arith.constant 0 : index
    %5 = vector.load %arg4[%c0_6, %c0_7] : memref<1x4xf32, #tpu.memory_space<vmem>>, vector<1x4xf32>
    %6 = vector.shape_cast %5 : vector<1x4xf32> to vector<1x1x4xf32>
    %7 = vector.broadcast %4 : vector<1x1x4xf32> to vector<1x1024x4xf32>
    %8 = arith.mulf %0, %7 : vector<1x1024x4xf32>
    %9 = vector.broadcast %2 : vector<1x1x4xf32> to vector<1x1024x4xf32>
    %10 = arith.addf %8, %9 : vector<1x1024x4xf32>
    %11 = vector.extract_strided_slice %10 {offsets = [0, 0, 3], sizes = [1, 1024, 1], strides = [1, 1, 1]} : vector<1x1024x4xf32> to vector<1x1024x1xf32>
    %cst = arith.constant 0.000000e+00 : f32
    %12 = vector.broadcast %cst : f32 to vector<1x1024x1xf32>
    %13 = arith.cmpf ogt, %11, %12 : vector<1x1024x1xf32>
    %14 = vector.broadcast %2 : vector<1x1x4xf32> to vector<1x1024x4xf32>
    %15 = arith.subf %10, %14 : vector<1x1024x4xf32>
    %16 = vector.broadcast %4 : vector<1x1x4xf32> to vector<1x1024x4xf32>
    %17 = arith.divf %15, %16 : vector<1x1024x4xf32>
    %18 = vector.shape_cast %13 : vector<1x1024x1xi1> to vector<1x1024x1xi1>
    %19 = vector.broadcast %18 : vector<1x1024x1xi1> to vector<1x1024x4xi1>
    %20 = vector.shape_cast %6 : vector<1x1x4xf32> to vector<1x1x4xf32>
    %21 = vector.broadcast %20 : vector<1x1x4xf32> to vector<1x1024x4xf32>
    %22 = arith.select %19, %17, %21 : vector<1x1024x4xi1>, vector<1x1024x4xf32>
    %c0_8 = arith.constant 0 : index
    %c0_9 = arith.constant 0 : index
    %c0_10 = arith.constant 0 : index
    %23 = vector.load %arg5[%c0_8, %c0_9, %c0_10] : memref<1x1024x4xf32, #tpu.memory_space<vmem>>, vector<1x1024x4xf32>
    tpu.vector_store %arg5[%c0_8, %c0_9, %c0_10], %22 {strides = array<i32>} : memref<1x1024x4xf32, #tpu.memory_space<vmem>>, vector<1x1024x4xf32>,
    return
  }
  func.func @transform_0(%arg0: i32) -> (i32, i32, i32) {
    %c0_i32 = arith.constant 0 : i32
    %c0_i32_0 = arith.constant 0 : i32
    %c0_i32_1 = arith.constant 0 : i32
    return %arg0, %c0_i32, %c0_i32_0 : i32, i32, i32
  }
  func.func @transform_1(%arg0: i32) -> (i32, i32) {
    %c0_i32 = arith.constant 0 : i32
    %c0_i32_0 = arith.constant 0 : i32
    %c0_i32_1 = arith.constant 0 : i32
    return %c0_i32, %c0_i32_0 : i32, i32
  }
  func.func @transform_2(%arg0: i32) -> (i32, i32) {
    %c0_i32 = arith.constant 0 : i32
    %c0_i32_0 = arith.constant 0 : i32
    %c0_i32_1 = arith.constant 0 : i32
    return %c0_i32, %c0_i32_0 : i32, i32
  }
  func.func @transform_3(%arg0: i32) -> (i32, i32) {
    %c0_i32 = arith.constant 0 : i32
    %c0_i32_0 = arith.constant 0 : i32
    %c0_i32_1 = arith.constant 0 : i32
    return %c0_i32, %c0_i32_0 : i32, i32
  }
  func.func @transform_4(%arg0: i32) -> (i32, i32, i32) {
    %c0_i32 = arith.constant 0 : i32
    %c0_i32_0 = arith.constant 0 : i32
    %c0_i32_1 = arith.constant 0 : i32
    return %arg0, %c0_i32, %c0_i32_0 : i32, i32, i32
  }
}

</mosaic_0001>

<bundles_post_ra>
// kernel: tpu_custom_call.1
= control target key start
LH: loop header
LB: loop body
LE: loop exit
PB: predicated region body
PF: predicated region fallthrough
CT: control target
= control target key end

     0   :  { %v1723_v0 = vmov 3   ;;  %v4215_v24 = vmov 0   ;;  %s4210_s0 = inlined_call_operand.vmem [shape: f32[1,1024,4], index: 0, kind: input, shape index: {}]   ;;  %s4211_s1 = inlined_call_operand.vmem [shape: f32[1,4], index: 1, kind: input, shape index: {}]   ;;  %s4212_s2 = inlined_call_operand.vmem [shape: f32[1,4], index: 2, kind: input, shape index: {}]   ;;  %s4213_s3 = inlined_call_operand.vmem [shape: f32[1,4], index: 3, kind: input, shape index: {}]   ;;  %s4214_s4 = inlined_call_operand.vmem [shape: f32[1,1024,4], index: 4, kind: output, shape index: {}]  }
   0x1   :  { %1714 = vset.pattern.permute.xlu1 %v1723_v0  ;;  %1713 = vset.pattern.permute.xlu0 %v1723_v0  ;;  %v19_v1 = vld [vmem:[%s4210_s0 + $0x10] sm:$0xff]  ;;  %v1756_v2 = vld [vmem:[%s4211_s1] ss:$0 sm:$0xff]  ;;  %v20_v6 = vld [vmem:[%s4210_s0 + $0x18] sm:$0xff] }
   0x2   :  { %v1761_v3 = vld [vmem:[%s4212_s2] ss:$0 sm:$0xff]  ;;  %v18_v7 = vld [vmem:[%s4210_s0 + $0x8] sm:$0xff]  ;;  %v24_v13 = vld [vmem:[%s4210_s0 + $0x38] sm:$0xff] }
   0x3   :  { %v156_v4 = vmul.f32 %v1761_v3, %v19_v1  ;;  %v17_v5 = vld [vmem:[%s4210_s0] sm:$0xff]  ;;  %v157_v9 = vmul.f32 %v1761_v3, %v20_v6  ;;  %v155_v10 = vmul.f32 %v1761_v3, %v18_v7  ;;  %v22_v11 = vld [vmem:[%s4210_s0 + $0x28] sm:$0xff]  ;;  %v23_v17 = vld [vmem:[%s4210_s0 + $0x30] sm:$0xff]  ;;  %v161_v22 = vmul.f32 %v1761_v3, %v24_v13 }
   0x4   :  { %v154_v8 = vmul.f32 %v1761_v3, %v17_v5  ;;  %v21_v12 = vld [vmem:[%s4210_s0 + $0x20] sm:$0xff]  ;;  %v159_v15 = vmul.f32 %v1761_v3, %v22_v11  ;;  %v160_v23 = vmul.f32 %v1761_v3, %v23_v17  ;;  %v26_v28 = vld [vmem:[%s4210_s0 + $0x48] sm:$0xff]  ;;  %v28_v36 = vld [vmem:[%s4210_s0 + $0x58] sm:$0xff]  ;;  %1715 = vrcp.f32 %v1761_v3 }
   0x5   :  { %v1786_v14 = vadd.f32 %v1756_v2, %v156_v4  ;;  %v158_v16 = vmul.f32 %v1761_v3, %v21_v12  ;;  %v1797_v19 = vadd.f32 %v1756_v2, %v157_v9  ;;  %v1800_v20 = vadd.f32 %v1756_v2, %v155_v10  ;;  %v25_v29 = vld [vmem:[%s4210_s0 + $0x40] sm:$0xff]  ;;  %v27_v37 = vld [vmem:[%s4210_s0 + $0x50] sm:$0xff]  ;;  %v30_v44 = vld [vmem:[%s4210_s0 + $0x68] sm:$0xff] }
   0x6   :  { %v1794_v18 = vadd.f32 %v1756_v2, %v154_v8  ;;  %v1804_v21 = vadd.f32 %v1756_v2, %v159_v15  ;;  %v1826_v32 = vadd.f32 %v1756_v2, %v161_v22  ;;  %v1830_v33 = vadd.f32 %v1756_v2, %v160_v23  ;;  %v29_v45 = vld [vmem:[%s4210_s0 + $0x60] sm:$0xff]  ;;  %v32_v52 = vld [vmem:[%s4210_s0 + $0x78] sm:$0xff]  ;;  %v31_v53 = vld [vmem:[%s4210_s0 + $0x70] sm:$0xff] }
   0x7   :  { %vm418_vm0 = vcmp.gt.f32.partialorder %v1786_v14, 0.0  ;;  %vm419_vm2 = vcmp.gt.f32.partialorder %v1797_v19, 0.0  ;;  %v1812_v26 = vadd.f32 %v1756_v2, %v158_v16  ;;  %vm417_vm3 = vcmp.gt.f32.partialorder %v1800_v20, 0.0  ;;  %v34_v60 = vld [vmem:[%s4210_s0 + $0x88] sm:$0xff]  ;;  %v33_v61 = vld [vmem:[%s4210_s0 + $0x80] sm:$0xff]  ;;  %v36_v6 = vld [vmem:[%s4210_s0 + $0x98] sm:$0xff] }
   0x8   :  { %v803_v25 = vsel %vm418_vm0, 1, %v4215_v24  ;;  %vm416_vm1 = vcmp.gt.f32.partialorder %v1794_v18, 0.0  ;;  %v804_v30 = vsel %vm419_vm2, 1, %v4215_v24  ;;  %v802_v31 = vsel %vm417_vm3, 1, %v4215_v24  ;;  %v35_v7 = vld [vmem:[%s4210_s0 + $0x90] sm:$0xff]  ;;  %v38_v15 = vld [vmem:[%s4210_s0 + $0xa8] sm:$0xff] }
   0x9   :  { %936 = vperm.xlu1 %1714, %v803_v25   ;;  %v801_v27 = vsel %vm416_vm1, 1, %v4215_v24  ;;  %vm421_vm4 = vcmp.gt.f32.partialorder %v1804_v21, 0.0  ;;  %vm420_vm5 = vcmp.gt.f32.partialorder %v1812_v26, 0.0  ;;  %v163_v34 = vmul.f32 %v1761_v3, %v26_v28  ;;  %v37_v16 = vld [vmem:[%s4210_s0 + $0xa0] sm:$0xff] }
   0xa   :  { %930 = vperm.xlu0 %1713, %v801_v27   ;;  %v162_v35 = vmul.f32 %v1761_v3, %v25_v29  ;;  %v806_v38 = vsel %vm421_vm4, 1, %v4215_v24  ;;  %v805_v39 = vsel %vm420_vm5, 1, %v4215_v24  ;;  %vm423_vm6 = vcmp.gt.f32.partialorder %v1826_v32, 0.0  ;;  %v40_v29 = vld [vmem:[%s4210_s0 + $0xb8] sm:$0xff] }
   0xb   :  { %v1844_v40 = vadd.f32 %v1756_v2, %v163_v34  ;;  %v165_v41 = vmul.f32 %v1761_v3, %v28_v36  ;;  %vm422_vm7 = vcmp.gt.f32.partialorder %v1830_v33, 0.0  ;;  %v164_v43 = vmul.f32 %v1761_v3, %v27_v37 }
   0xc   :  { %v1849_v42 = vadd.f32 %v1756_v2, %v162_v35  ;;  %v808_v46 = vsel %vm423_vm6, 1, %v4215_v24  ;;  %v807_v47 = vsel %vm422_vm7, 1, %v4215_v24  ;;  %v167_v49 = vmul.f32 %v1761_v3, %v30_v44 }
   0xd   :  { %939 = vperm.xlu1 %1714, %v804_v30   ;;  %vm425_vm8 = vcmp.gt.f32.partialorder %v1844_v40, 0.0  ;;  %v1862_v48 = vadd.f32 %v1756_v2, %v165_v41  ;;  %v1867_v50 = vadd.f32 %v1756_v2, %v164_v43  ;;  %v166_v51 = vmul.f32 %v1761_v3, %v29_v45  ;;  %v39_v30 = vld [vmem:[%s4210_s0 + $0xb0] sm:$0xff]  ;;  %v41_v41 = vld [vmem:[%s4210_s0 + $0xc0] sm:$0xff] }
   0xe   :  { %933 = vperm.xlu0 %1713, %v802_v31   ;;  %vm424_vm9 = vcmp.gt.f32.partialorder %v1849_v42, 0.0  ;;  %v810_v54 = vsel %vm425_vm8, 1, %v4215_v24  ;;  %v1880_v56 = vadd.f32 %v1756_v2, %v167_v49  ;;  %v169_v57 = vmul.f32 %v1761_v3, %v32_v52  ;;  %v43_v52 = vld [vmem:[%s4210_s0 + $0xd0] sm:$0xff] }
   0xf   :  { %v809_v55 = vsel %vm424_vm9, 1, %v4215_v24  ;;  %vm427_vm10 = vcmp.gt.f32.partialorder %v1862_v48, 0.0  ;;  %vm426_vm11 = vcmp.gt.f32.partialorder %v1867_v50, 0.0  ;;  %v1885_v58 = vadd.f32 %v1756_v2, %v166_v51  ;;  %v44_v51 = vld [vmem:[%s4210_s0 + $0xd8] sm:$0xff] }
  0x10   :  { %v168_v59 = vmul.f32 %v1761_v3, %v31_v53  ;;  %v812_v62 = vsel %vm427_vm10, 1, %v4215_v24  ;;  %v811_v63 = vsel %vm426_vm11, 1, %v4215_v24  ;;  %vm429_vm12 = vcmp.gt.f32.partialorder %v1880_v56, 0.0 }
  0x11   :  { %945 = vperm.xlu1 %1714, %v806_v38   ;;  %v1898_v0 = vadd.f32 %v1756_v2, %v169_v57  ;;  %v171_v1 = vmul.f32 %v1761_v3, %v34_v60  ;;  %vm428_vm13 = vcmp.gt.f32.partialorder %v1885_v58, 0.0  ;;  %v170_v5 = vmul.f32 %v1761_v3, %v33_v61  ;;  %v46_v61 = vld [vmem:[%s4210_s0 + $0xe8] sm:$0xff] }
  0x12   :  { %942 = vperm.xlu0 %1713, %v805_v39   ;;  %v1903_v4 = vadd.f32 %v1756_v2, %v168_v59  ;;  %v814_v8 = vsel %vm429_vm12, 1, %v4215_v24  ;;  %v813_v9 = vsel %vm428_vm13, 1, %v4215_v24  ;;  %v173_v11 = vmul.f32 %v1761_v3, %v36_v6  ;;  %v42_v39 = vld [vmem:[%s4210_s0 + $0xc8] sm:$0xff] }
  0x13   :  { %vm431_vm14 = vcmp.gt.f32.partialorder %v1898_v0, 0.0  ;;  %v1916_v10 = vadd.f32 %v1756_v2, %v171_v1  ;;  %v1921_v12 = vadd.f32 %v1756_v2, %v170_v5  ;;  %v172_v13 = vmul.f32 %v1761_v3, %v35_v7 }
  0x14   :  { %vm430_vm15 = vcmp.gt.f32.partialorder %v1903_v4, 0.0  ;;  %v816_v17 = vsel %vm431_vm14, 1, %v4215_v24  ;;  %v1934_v23 = vadd.f32 %v1756_v2, %v173_v11  ;;  %v175_v25 = vmul.f32 %v1761_v3, %v38_v15  ;;  %v47_v11 = vld [vmem:[%s4210_s0 + $0xf0] sm:$0xff] }
  0x15   :  { %951 = vperm.xlu1 %1714, %v808_v46   ;;  %v815_v22 = vsel %vm430_vm15, 1, %v4215_v24  ;;  %vm433_vm0 = vcmp.gt.f32.partialorder %v1916_v10, 0.0  ;;  %vm432_vm1 = vcmp.gt.f32.partialorder %v1921_v12, 0.0  ;;  %v1939_v27 = vadd.f32 %v1756_v2, %v172_v13 }
  0x16   :  { %948 = vperm.xlu0 %1713, %v807_v47   ;;  %v174_v28 = vmul.f32 %v1761_v3, %v37_v16  ;;  %v818_v31 = vsel %vm433_vm0, 1, %v4215_v24  ;;  %v817_v34 = vsel %vm432_vm1, 1, %v4215_v24  ;;  %vm435_vm2 = vcmp.gt.f32.partialorder %v1934_v23, 0.0 }
  0x17   :  { %v1952_v35 = vadd.f32 %v1756_v2, %v175_v25  ;;  %v177_v36 = vmul.f32 %v1761_v3, %v40_v29  ;;  %vm434_vm3 = vcmp.gt.f32.partialorder %v1939_v27, 0.0  ;;  %v176_v38 = vmul.f32 %v1761_v3, %v39_v30  ;;  %v49_v29 = vld [vmem:[%s4210_s0 + $0x100] sm:$0xff] }
  0x18   :  { %v1957_v37 = vadd.f32 %v1756_v2, %v174_v28  ;;  %v820_v43 = vsel %vm435_vm2, 1, %v4215_v24  ;;  %v819_v44 = vsel %vm434_vm3, 1, %v4215_v24  ;;  %v179_v46 = vmul.f32 %v1761_v3, %v42_v39  ;;  %v50_v28 = vld [vmem:[%s4210_s0 + $0x108] sm:$0xff] }
  0x19   :  { %957 = vperm.xlu1 %1714, %v810_v54   ;;  %vm437_vm4 = vcmp.gt.f32.partialorder %v1952_v35, 0.0  ;;  %v1970_v45 = vadd.f32 %v1756_v2, %v177_v36  ;;  %v1975_v47 = vadd.f32 %v1756_v2, %v176_v38  ;;  %v178_v49 = vmul.f32 %v1761_v3, %v41_v41  ;;  %v52_v41 = vld [vmem:[%s4210_s0 + $0x118] sm:$0xff] }
  0x1a   :  { %954 = vperm.xlu0 %1713, %v809_v55   ;;  %vm436_vm5 = vcmp.gt.f32.partialorder %v1957_v37, 0.0  ;;  %v822_v53 = vsel %vm437_vm4, 1, %v4215_v24  ;;  %v1988_v55 = vadd.f32 %v1756_v2, %v179_v46  ;;  %v181_v57 = vmul.f32 %v1761_v3, %v44_v51 }
  0x1b   :  { %v821_v54 = vsel %vm436_vm5, 1, %v4215_v24  ;;  %vm439_vm6 = vcmp.gt.f32.partialorder %v1970_v45, 0.0  ;;  %vm438_vm7 = vcmp.gt.f32.partialorder %v1975_v47, 0.0  ;;  %v1993_v59 = vadd.f32 %v1756_v2, %v178_v49 }
  0x1c   :  { %v180_v60 = vmul.f32 %v1761_v3, %v43_v52  ;;  %v823_v1 = vsel %vm438_vm7, 1, %v4215_v24  ;;  %vm441_vm8 = vcmp.gt.f32.partialorder %v1988_v55, 0.0  ;;  %v2006_v5 = vadd.f32 %v1756_v2, %v181_v57  ;;  %v53_v57 = vld [vmem:[%s4210_s0 + $0x120] sm:$0xff] }
  0x1d   :  { %963 = vperm.xlu1 %1714, %v812_v62   ;;  %v45_v62 = vld [vmem:[%s4210_s0 + $0xe0] sm:$0xff]  ;;  %v183_v6 = vmul.f32 %v1761_v3, %v46_v61  ;;  %vm440_vm9 = vcmp.gt.f32.partialorder %v1993_v59, 0.0  ;;  %v826_v13 = vsel %vm441_vm8, 1, %v4215_v24  ;;  %v184_v25 = vmul.f32 %v1761_v3, %v47_v11 }
  0x1e   :  { %960 = vperm.xlu0 %1713, %v811_v63   ;;  %v824_v63 = vsel %vm439_vm6, 1, %v4215_v24  ;;  %v2011_v7 = vadd.f32 %v1756_v2, %v180_v60  ;;  %v825_v15 = vsel %vm440_vm9, 1, %v4215_v24  ;;  %vm443_vm10 = vcmp.gt.f32.partialorder %v2006_v5, 0.0 }
  0x1f   :  { %v2024_v16 = vadd.f32 %v1756_v2, %v183_v6  ;;  %v828_v30 = vsel %vm443_vm10, 1, %v4215_v24  ;;  %v187_v36 = vmul.f32 %v1761_v3, %v50_v28  ;;  %v2047_v38 = vadd.f32 %v1756_v2, %v184_v25 }
  0x20   :  { %vm442_vm11 = vcmp.gt.f32.partialorder %v2011_v7, 0.0  ;;  %v186_v39 = vmul.f32 %v1761_v3, %v49_v29  ;;  %v189_v51 = vmul.f32 %v1761_v3, %v52_v41  ;;  %v190_v6 = vmul.f32 %v1761_v3, %v53_v57  ;;  %v58_v29 = vld [vmem:[%s4210_s0 + $0x148] sm:$0xff] }
  0x21   :  { %969 = vperm.xlu1 %1714, %v814_v8   ;;  %v182_v8 = vmul.f32 %v1761_v3, %v45_v62  ;;  %vm445_vm12 = vcmp.gt.f32.partialorder %v2024_v16, 0.0  ;;  %v2060_v49 = vadd.f32 %v1756_v2, %v187_v36  ;;  %vm446_vm15 = vcmp.gt.f32.partialorder %v2047_v38, 0.0 }
  0x22   :  { %966 = vperm.xlu0 %1713, %v813_v9   ;;  %v48_v9 = vld [vmem:[%s4210_s0 + $0xf8] sm:$0xff]  ;;  %v2065_v52 = vadd.f32 %v1756_v2, %v186_v39  ;;  %v831_v61 = vsel %vm446_vm15, 1, %v4215_v24  ;;  %v2078_v62 = vadd.f32 %v1756_v2, %v189_v51  ;;  %v2101_v25 = vadd.f32 %v1756_v2, %v190_v6  ;;  %v59_v51 = vld [vmem:[%s4210_s0 + $0x150] sm:$0xff]  ;;  %v62_v6 = vld [vmem:[%s4210_s0 + $0x168] sm:$0xff] }
  0x23   :  { %vm449_vm0 = vcmp.gt.f32.partialorder %v2060_v49, 0.0  ;;  %v195_v41 = vmul.f32 %v1761_v3, %v58_v29 }
  0x24   :  { %vm448_vm1 = vcmp.gt.f32.partialorder %v2065_v52, 0.0  ;;  %v834_v11 = vsel %vm449_vm0, 1, %v4215_v24  ;;  %vm451_vm2 = vcmp.gt.f32.partialorder %v2078_v62, 0.0  ;;  %vm452_vm5 = vcmp.gt.f32.partialorder %v2101_v25, 0.0 }
  0x25   :  { %975 = vperm.xlu1 %1714, %v816_v17   ;;  %v185_v17 = vmul.f32 %v1761_v3, %v48_v9  ;;  %v55_v9 = vld [vmem:[%s4210_s0 + $0x130] sm:$0xff]  ;;  %v2132_v57 = vadd.f32 %v1756_v2, %v195_v41 }
  0x26   :  { %972 = vperm.xlu0 %1713, %v815_v22   ;;  %v2029_v22 = vadd.f32 %v1756_v2, %v182_v8  ;;  %v56_v8 = vld [vmem:[%s4210_s0 + $0x138] sm:$0xff]  ;;  %v192_v28 = vmul.f32 %v1761_v3, %v55_v9 }
  0x27   :  { %vm457_vm8 = vcmp.gt.f32.partialorder %v2132_v57, 0.0 }
  0x28   :  { %vm444_vm13 = vcmp.gt.f32.partialorder %v2029_v22, 0.0 }
  0x29   :  { %981 = vperm.xlu1 %1714, %v818_v31   ;;  %v827_v31 = vsel %vm442_vm11, 1, %v4215_v24  ;;  %v829_v46 = vsel %vm444_vm13, 1, %v4215_v24 }
  0x2a   :  { %978 = vperm.xlu0 %1713, %v817_v34   ;;  %v2042_v34 = vadd.f32 %v1756_v2, %v185_v17  ;;  %v193_v17 = vmul.f32 %v1761_v3, %v56_v8  ;;  %v61_v8 = vld [vmem:[%s4210_s0 + $0x160] sm:$0xff] }
  0x2b   :  { %v198_v29 = vmul.f32 %v1761_v3, %v61_v8 }
  0x2c   :  { %vm447_vm14 = vcmp.gt.f32.partialorder %v2042_v34, 0.0  ;;  %v2114_v39 = vadd.f32 %v1756_v2, %v193_v17  ;;  %v199_v17 = vmul.f32 %v1761_v3, %v62_v6 }
  0x2d   :  { %987 = vperm.xlu1 %1714, %v820_v43   ;;  %v51_v43 = vld [vmem:[%s4210_s0 + $0x110] sm:$0xff]  ;;  %v832_v60 = vsel %vm447_vm14, 1, %v4215_v24 }
  0x2e   :  { %984 = vperm.xlu0 %1713, %v819_v44   ;;  %v830_v44 = vsel %vm445_vm12, 1, %v4215_v24  ;;  %vm455_vm6 = vcmp.gt.f32.partialorder %v2114_v39, 0.0 }
  0x2f   :  { %v840_v9 = vsel %vm455_vm6, 1, %v4215_v24 }
  0x31   :  { %993 = vperm.xlu1 %1714, %v822_v53   ;;  %v188_v53 = vmul.f32 %v1761_v3, %v51_v43  ;;  %v2119_v43 = vadd.f32 %v1756_v2, %v192_v28 }
  0x32   :  { %990 = vperm.xlu0 %1713, %v821_v54   ;;  %v54_v54 = vld [vmem:[%s4210_s0 + $0x128] sm:$0xff] }
  0x33   :  { %vm454_vm7 = vcmp.gt.f32.partialorder %v2119_v43, 0.0 }
  0x35   :  { %999 = vperm.xlu1 %1714, %v824_v63   ;;  %v191_v63 = vmul.f32 %v1761_v3, %v54_v54  ;;  %v837_v54 = vsel %vm452_vm5, 1, %v4215_v24 }
  0x36   :  { %996 = vperm.xlu0 %1713, %v823_v1   ;;  %v2083_v1 = vadd.f32 %v1756_v2, %v188_v53 }
  0x38   :  { %vm450_vm3 = vcmp.gt.f32.partialorder %v2083_v1, 0.0 }
  0x39   :  { %1005 = vperm.xlu1 %1714, %v826_v13   ;;  %v833_v13 = vsel %vm448_vm1, 1, %v4215_v24  ;;  %v835_v36 = vsel %vm450_vm3, 1, %v4215_v24 }
  0x3a   :  { %1002 = vperm.xlu0 %1713, %v825_v15   ;;  %v2096_v15 = vadd.f32 %v1756_v2, %v191_v63  ;;  %v196_v63 = vmul.f32 %v1761_v3, %v59_v51  ;;  %v2173_v51 = vadd.f32 %v1756_v2, %v198_v29  ;;  %v68_v29 = vld [vmem:[%s4210_s0 + $0x198] sm:$0xff] }
  0x3c   :  { %vm453_vm4 = vcmp.gt.f32.partialorder %v2096_v15, 0.0  ;;  %v2155_v28 = vadd.f32 %v1756_v2, %v196_v63  ;;  %4271 = vst [vmem:[#allocation5_spill] sm:$0xff] %v2173_v51  ;;  %vm460_vm13 = vcmp.gt.f32.partialorder %v2173_v51, 0.0  ;;  %v85_v51 = vld [vmem:[%s4210_s0 + $0x220] sm:$0xff] }
  0x3d   :  { %1011 = vperm.xlu1 %1714, %v828_v30   ;;  %v57_v30 = vld [vmem:[%s4210_s0 + $0x140] sm:$0xff]  ;;  %v838_v53 = vsel %vm453_vm4, 1, %v4215_v24 }
  0x3e   :  { %1008 = vperm.xlu0 %1713, %v827_v31   ;;  %v836_v31 = vsel %vm451_vm2, 1, %v4215_v24  ;;  %4269 = vst [vmem:[#allocation3_spill] sm:$0xff] %v2155_v28  ;;  %vm458_vm11 = vcmp.gt.f32.partialorder %v2155_v28, 0.0 }
  0x3f   :  { %v843_v6 = vsel %vm458_vm11, 1, %v4215_v24 }
  0x41   :  { %1017 = vperm.xlu1 %1714, %v830_v44   ;;  %v194_v44 = vmul.f32 %v1761_v3, %v57_v30  ;;  %v64_v30 = vld [vmem:[%s4210_s0 + $0x178] sm:$0xff] }
  0x42   :  { %1014 = vperm.xlu0 %1713, %v829_v46   ;;  %v60_v46 = vld [vmem:[%s4210_s0 + $0x158] sm:$0xff] }
  0x45   :  { %1023 = vperm.xlu1 %1714, %v832_v60   ;;  %v197_v60 = vmul.f32 %v1761_v3, %v60_v46  ;;  %v201_v46 = vmul.f32 %v1761_v3, %v64_v30  ;;  %v67_v30 = vld [vmem:[%s4210_s0 + $0x190] sm:$0xff] }
  0x46   :  { %1020 = vperm.xlu0 %1713, %v831_v61   ;;  %v2137_v61 = vadd.f32 %v1756_v2, %v194_v44  ;;  %v2168_v44 = vadd.f32 %v1756_v2, %v199_v17 }
  0x47   :  { %v2186_v8 = vadd.f32 %v1756_v2, %v201_v46  ;;  %v205_v46 = vmul.f32 %v1761_v3, %v68_v29 }
  0x48   :  { %vm456_vm9 = vcmp.gt.f32.partialorder %v2137_v61, 0.0  ;;  %4270 = vst [vmem:[#allocation4_spill] sm:$0xff] %v2168_v44  ;;  %vm461_vm12 = vcmp.gt.f32.partialorder %v2168_v44, 0.0 }
  0x49   :  { %1029 = vperm.xlu1 %1714, %v834_v11   ;;  %v839_v11 = vsel %vm454_vm7, 1, %v4215_v24  ;;  %v841_v41 = vsel %vm456_vm9, 1, %v4215_v24  ;;  %4272 = vst [vmem:[#allocation6_spill] sm:$0xff] %v2186_v8  ;;  %vm463_vm14 = vcmp.gt.f32.partialorder %v2186_v8, 0.0 }
  0x4a   :  { %1026 = vperm.xlu0 %1713, %v833_v13   ;;  %v2150_v13 = vadd.f32 %v1756_v2, %v197_v60  ;;  %v65_v60 = vld [vmem:[%s4210_s0 + $0x180] sm:$0xff] }
  0x4b   :  { %v202_v17 = vmul.f32 %v1761_v3, %v65_v60  ;;  %v70_v60 = vld [vmem:[%s4210_s0 + $0x1a8] sm:$0xff] }
  0x4c   :  { %4268 = vst [vmem:[#allocation2_spill] sm:$0xff] %v2150_v13  ;;  %vm459_vm10 = vcmp.gt.f32.partialorder %v2150_v13, 0.0  ;;  %v207_v29 = vmul.f32 %v1761_v3, %v70_v60 }
  0x4d   :  { %1035 = vperm.xlu1 %1714, %v836_v31   ;;  %v63_v31 = vld [vmem:[%s4210_s0 + $0x170] sm:$0xff]  ;;  %v844_v63 = vsel %vm459_vm10, 1, %v4215_v24 }
  0x4e   :  { %1032 = vperm.xlu0 %1713, %v835_v36   ;;  %v842_v36 = vsel %vm457_vm8, 1, %v4215_v24 }
  0x51   :  { %1041 = vperm.xlu1 %1714, %v838_v53   ;;  %v200_v53 = vmul.f32 %v1761_v3, %v63_v31  ;;  %v846_v31 = vsel %vm461_vm12, 1, %v4215_v24 }
  0x52   :  { %1038 = vperm.xlu0 %1713, %v837_v54   ;;  %v66_v54 = vld [vmem:[%s4210_s0 + $0x188] sm:$0xff] }
  0x55   :  { %1047 = vperm.xlu1 %1714, %v840_v9   ;;  %v203_v9 = vmul.f32 %v1761_v3, %v66_v54  ;;  %v204_v54 = vmul.f32 %v1761_v3, %v67_v30 }
  0x56   :  { %1044 = vperm.xlu0 %1713, %v839_v11   ;;  %v2191_v11 = vadd.f32 %v1756_v2, %v200_v53  ;;  %v2209_v53 = vadd.f32 %v1756_v2, %v202_v17  ;;  %v2222_v17 = vadd.f32 %v1756_v2, %v205_v46  ;;  %v4278_v46 = vmov 0  }
  0x57   :  { %v2227_v30 = vadd.f32 %v1756_v2, %v204_v54  ;;  %v2240_v54 = vadd.f32 %v1756_v2, %v207_v29 }
  0x58   :  { %4273 = vst [vmem:[#allocation7_spill] sm:$0xff] %v2191_v11  ;;  %vm462_vm15 = vcmp.gt.f32.partialorder %v2191_v11, 0.0  ;;  %4275 = vst [vmem:[#allocation9_spill] sm:$0xff] %v2209_v53  ;;  %vm464_vm1 = vcmp.gt.f32.partialorder %v2209_v53, 0.0  ;;  %vm467_vm2 = vcmp.gt.f32.partialorder %v2222_v17, 0.0 }
  0x59   :  { %1053 = vperm.xlu1 %1714, %v842_v36   ;;  %v845_v36 = vsel %vm460_vm13, 1, %v4215_v24  ;;  %4276 = vst [vmem:[#allocation10_spill] sm:$0xff] %v2222_v17  ;;  %4277 = vst [vmem:[#allocation11_spill] sm:$0xff] %v2227_v30  ;;  %v849_v60 = vsel %vm464_vm1, 1, %v4278_v46  ;;  %vm466_vm3 = vcmp.gt.f32.partialorder %v2227_v30, 0.0  ;;  %v73_v17 = vld [vmem:[%s4210_s0 + $0x1c0] sm:$0xff] }
  0x5a   :  { %1050 = vperm.xlu0 %1713, %v841_v41   ;;  %v2204_v41 = vadd.f32 %v1756_v2, %v203_v9  ;;  %v847_v9 = vsel %vm462_vm15, 1, %v4215_v24  ;;  %4279 = vst [vmem:[#allocation12_spill] sm:$0xff] %v2240_v54  ;;  %v852_v29 = vsel %vm467_vm2, 1, %v4278_v46  ;;  %vm469_vm4 = vcmp.gt.f32.partialorder %v2240_v54, 0.0  ;;  %v75_v54 = vld [vmem:[%s4210_s0 + $0x1d0] sm:$0xff] }
  0x5b   :  { %v210_v30 = vmul.f32 %v1761_v3, %v73_v17  ;;  %vm1575_vm15 = vcmask 31744  }
  0x5c   :  { %4274 = vst [vmem:[#allocation8_spill] sm:$0xff] %v2204_v41  ;;  %vm465_vm0 = vcmp.gt.f32.partialorder %v2204_v41, 0.0 }
  0x5d   :  { %1059 = vperm.xlu1 %1714, %v844_v63   ;;  %v69_v63 = vld [vmem:[%s4210_s0 + $0x1a0] sm:$0xff]  ;;  %v850_v41 = vsel %vm465_vm0, 1, %v4278_v46 }
  0x5e   :  { %1056 = vperm.xlu0 %1713, %v843_v6   ;;  %v848_v6 = vsel %vm463_vm14, 1, %v4215_v24  ;;  %v71_v24 = vld [vmem:[%s4210_s0 + $0x1b0] sm:$0xff] }
  0x5f   :  { %v208_v53 = vmul.f32 %v1761_v3, %v71_v24 }
  0x61   :  { %1065 = vperm.xlu1 %1714, %v846_v31   ;;  %v206_v31 = vmul.f32 %v1761_v3, %v69_v63 }
  0x62   :  { %1062 = vperm.xlu0 %1713, %v845_v36   ;;  %v72_v36 = vld [vmem:[%s4210_s0 + $0x1b8] sm:$0xff] }
  0x63   :  { %v209_v63 = vmul.f32 %v1761_v3, %v72_v36  ;;  %v851_v36 = vsel %vm466_vm3, 1, %v4278_v46 }
  0x65   :  { %1071 = vperm.xlu1 %1714, %v848_v6   ;;  %v2245_v6 = vadd.f32 %v1756_v2, %v206_v31  ;;  %v2258_v31 = vadd.f32 %v1756_v2, %v209_v63  ;;  %v854_v63 = vsel %vm469_vm4, 1, %v4278_v46 }
  0x66   :  { %1068 = vperm.xlu0 %1713, %v847_v9   ;;  %v74_v9 = vld [vmem:[%s4210_s0 + $0x1c8] sm:$0xff] }
  0x67   :  { %4280 = vst [vmem:[#allocation13_spill] sm:$0xff] %v2245_v6  ;;  %4281 = vst [vmem:[#allocation14_spill] sm:$0xff] %v2258_v31  ;;  %v211_v24 = vmul.f32 %v1761_v3, %v74_v9  ;;  %vm468_vm5 = vcmp.gt.f32.partialorder %v2245_v6, 0.0  ;;  %vm471_vm6 = vcmp.gt.f32.partialorder %v2258_v31, 0.0  ;;  %v212_v6 = vmul.f32 %v1761_v3, %v75_v54  ;;  %v77_v31 = vld [vmem:[%s4210_s0 + $0x1e0] sm:$0xff] }
  0x68   :  { %v853_v9 = vsel %vm468_vm5, 1, %v4278_v46 }
  0x69   :  { %1077 = vperm.xlu1 %1714, %v850_v41   ;;  %v2263_v41 = vadd.f32 %v1756_v2, %v208_v53  ;;  %v2276_v53 = vadd.f32 %v1756_v2, %v211_v24  ;;  %v856_v24 = vsel %vm471_vm6, 1, %v4278_v46 }
  0x6a   :  { %1074 = vperm.xlu0 %1713, %v849_v60   ;;  %v76_v60 = vld [vmem:[%s4210_s0 + $0x1d8] sm:$0xff] }
  0x6b   :  { %4282 = vst [vmem:[#allocation15_spill] sm:$0xff] %v2263_v41  ;;  %4283 = vst [vmem:[#allocation16_spill] sm:$0xff] %v2276_v53  ;;  %v213_v17 = vmul.f32 %v1761_v3, %v76_v60  ;;  %vm470_vm7 = vcmp.gt.f32.partialorder %v2263_v41, 0.0  ;;  %vm473_vm8 = vcmp.gt.f32.partialorder %v2276_v53, 0.0  ;;  %v214_v41 = vmul.f32 %v1761_v3, %v77_v31  ;;  %v79_v53 = vld [vmem:[%s4210_s0 + $0x1f0] sm:$0xff] }
  0x6c   :  { %v855_v60 = vsel %vm470_vm7, 1, %v4278_v46 }
  0x6d   :  { %1083 = vperm.xlu1 %1714, %v852_v29   ;;  %v2281_v29 = vadd.f32 %v1756_v2, %v210_v30  ;;  %v2295_v30 = vadd.f32 %v1756_v2, %v213_v17  ;;  %v858_v17 = vsel %vm473_vm8, 1, %v4278_v46 }
  0x6e   :  { %1080 = vperm.xlu0 %1713, %v851_v36   ;;  %v78_v36 = vld [vmem:[%s4210_s0 + $0x1e8] sm:$0xff] }
  0x6f   :  { %4284 = vst [vmem:[#allocation17_spill] sm:$0xff] %v2281_v29  ;;  %4285 = vst [vmem:[#allocation18_spill] sm:$0xff] %v2295_v30  ;;  %v215_v54 = vmul.f32 %v1761_v3, %v78_v36  ;;  %vm472_vm9 = vcmp.gt.f32.partialorder %v2281_v29, 0.0  ;;  %vm475_vm10 = vcmp.gt.f32.partialorder %v2295_v30, 0.0  ;;  %v2321_v29 = vadd.f32 %v1756_v2, %v214_v41  ;;  %v81_v30 = vld [vmem:[%s4210_s0 + $0x200] sm:$0xff]  ;;  %v84_v41 = vld [vmem:[%s4210_s0 + $0x218] sm:$0xff] }
  0x70   :  { %v857_v36 = vsel %vm472_vm9, 1, %v4278_v46 }
  0x71   :  { %1089 = vperm.xlu1 %1714, %v854_v63   ;;  %v2300_v63 = vadd.f32 %v1756_v2, %v212_v6  ;;  %v2313_v6 = vadd.f32 %v1756_v2, %v215_v54  ;;  %4288 = vst [vmem:[#allocation21_spill] sm:$0xff] %v2321_v29  ;;  %v860_v54 = vsel %vm475_vm10, 1, %v4278_v46  ;;  %vm476_vm13 = vcmp.gt.f32.partialorder %v2321_v29, 0.0 }
  0x72   :  { %1086 = vperm.xlu0 %1713, %v853_v9   ;;  %v80_v9 = vld [vmem:[%s4210_s0 + $0x1f8] sm:$0xff]  ;;  %v221_v29 = vmul.f32 %v1761_v3, %v84_v41  ;;  %v861_v8 = vsel %vm476_vm13, 1, %v4278_v46  ;;  %v545_v41 = vsub.f32 %v1800_v20, %v1756_v2 }
  0x73   :  { %4286 = vst [vmem:[#allocation19_spill] sm:$0xff] %v2300_v63  ;;  %4287 = vst [vmem:[#allocation20_spill] sm:$0xff] %v2313_v6  ;;  %v217_v31 = vmul.f32 %v1761_v3, %v80_v9  ;;  %vm474_vm11 = vcmp.gt.f32.partialorder %v2300_v63, 0.0  ;;  %vm477_vm12 = vcmp.gt.f32.partialorder %v2313_v6, 0.0 }
  0x74   :  { %v859_v11 = vsel %vm474_vm11, 1, %v4278_v46 }
  0x75   :  { %1095 = vperm.xlu1 %1714, %v856_v24   ;;  %v82_v24 = vld [vmem:[%s4210_s0 + $0x208] sm:$0xff]  ;;  %v2332_v63 = vadd.f32 %v1756_v2, %v217_v31  ;;  %v546_v31 = vsub.f32 %v1786_v14, %v1756_v2 }
  0x76   :  { %1092 = vperm.xlu0 %1713, %v855_v60   ;;  %v216_v60 = vmul.f32 %v1761_v3, %v79_v53  ;;  %v219_v9 = vmul.f32 %v1761_v3, %v82_v24  ;;  %v862_v24 = vsel %vm477_vm12, 1, %v4278_v46 }
  0x77   :  { %4289 = vst [vmem:[#allocation22_spill] sm:$0xff] %v2332_v63  ;;  %vm479_vm14 = vcmp.gt.f32.partialorder %v2332_v63, 0.0 }
  0x78   :  { %v2339_v53 = vadd.f32 %v1756_v2, %v216_v60  ;;  %v2349_v6 = vadd.f32 %v1756_v2, %v219_v9  ;;  %v2355_v60 = vpop.eup %1715  ;;  %v547_v9 = vsub.f32 %v1797_v19, %v1756_v2  ;;  %v2380_v19 = vadd.f32 %v1756_v2, %v221_v29  ;;  %v88_v29 = vld [vmem:[%s4210_s0 + $0x238] sm:$0xff] }
  0x79   :  { %1101 = vperm.xlu1 %1714, %v858_v17   ;;  %v218_v17 = vmul.f32 %v1761_v3, %v81_v30  ;;  %v86_v30 = vld [vmem:[%s4210_s0 + $0x228] sm:$0xff] }
  0x7a   :  { %1098 = vperm.xlu0 %1713, %v857_v36   ;;  %4290 = vst [vmem:[#allocation23_spill] sm:$0xff] %v2339_v53  ;;  %v83_v36 = vld [vmem:[%s4210_s0 + $0x210] sm:$0xff]  ;;  %vm478_vm0 = vcmp.gt.f32.partialorder %v2339_v53, 0.0  ;;  %v223_v63 = vmul.f32 %v1761_v3, %v86_v30  ;;  %vm481_vm1 = vcmp.gt.f32.partialorder %v2349_v6, 0.0  ;;  %v676_v53 = vmul.f32 %v2355_v60, %v547_v9 }
  0x7b   :  { %v2363_v14 = vadd.f32 %v1756_v2, %v218_v17  ;;  %v675_v17 = vmul.f32 %v2355_v60, %v546_v31  ;;  %v2390_v31 = vld [vmem:[%s4213_s3] ss:$0 sm:$0xff]  ;;  %v866_v28 = vsel %vm481_vm1, 1, %v4278_v46  ;;  %v87_v30 = vld [vmem:[%s4210_s0 + $0x230] sm:$0xff]  ;;  %vm483_vm5 = vcmp.gt.f32.partialorder %v2380_v19, 0.0 }
  0x7c   :  { %v2410_v13 = vadd.f32 %v1756_v2, %v223_v63 }
  0x7d   :  { %1107 = vperm.xlu1 %1714, %v860_v54   ;;  %v544_v54 = vsub.f32 %v1794_v18, %v1756_v2  ;;  %v549_v18 = vsub.f32 %v1804_v21, %v1756_v2  ;;  %v548_v21 = vsub.f32 %v1812_v26, %v1756_v2  ;;  %vm480_vm2 = vcmp.gt.f32.partialorder %v2363_v14, 0.0 }
  0x7e   :  { %1104 = vperm.xlu0 %1713, %v859_v11   ;;  %v220_v11 = vmul.f32 %v1761_v3, %v83_v36  ;;  %v864_v36 = vsel %vm479_vm14, 1, %v4278_v46  ;;  %vm485_vm8 = vcmp.gt.f32.partialorder %v2410_v13, 0.0 }
  0x7f   :  { %v673_v20 = vmul.f32 %v2355_v60, %v544_v54  ;;  %v222_v54 = vmul.f32 %v1761_v3, %v85_v51  ;;  %v225_v51 = vmul.f32 %v1761_v3, %v88_v29 }
  0x81   :  { %1113 = vperm.xlu1 %1714, %v862_v24   ;;  %v551_v24 = vsub.f32 %v1826_v32, %v1756_v2  ;;  %v2402_v32 = vadd.f32 %v1756_v2, %v220_v11 }
  0x82   :  { %1110 = vperm.xlu0 %1713, %v861_v8   ;;  %v863_v8 = vsel %vm478_vm0, 1, %v4278_v46 }
  0x83   :  { %vm482_vm6 = vcmp.gt.f32.partialorder %v2402_v32, 0.0 }
  0x84   :  { %v937_v26 = vpop.permute.xlu1 %936 }
  0x85   :  { %vm1315_vm3 = vcmp.eq.s32.totalorder %v937_v26, 1  ;;  %v931_v44 = vpop.permute.xlu0 %930  ;;  %1119 = vperm.xlu1 %1714, %v864_v36   ;;  %v674_v36 = vmul.f32 %v2355_v60, %v545_v41  ;;  %v2440_v41 = vadd.f32 %v1756_v2, %v222_v54 }
  0x86   :  { %v1449_v11 = vsel %vm1315_vm3, %v675_v17, %v2390_v31  ;;  %vm1313_vm4 = vcmp.eq.s32.totalorder %v931_v44, 1  ;;  %1116 = vperm.xlu0 %1713, %v863_v8   ;;  %v865_v44 = vsel %vm480_vm2, 1, %v4278_v46  ;;  %v90_v17 = vld [vmem:[%s4210_s0 + $0x248] sm:$0xff]  ;;  %v868_v8 = vsel %vm483_vm5, 1, %v4278_v46 }
  0x87   :  { %1578 = vst.msk [vmem:[%s4214_s4 + $0x10] sm:$0xff] %vm1575_vm15, %v1449_v11  ;;  %v1447_v63 = vsel %vm1313_vm4, %v673_v20, %v2390_v31  ;;  %v224_v20 = vmul.f32 %v1761_v3, %v87_v30  ;;  %v678_v11 = vmul.f32 %v2355_v60, %v549_v18  ;;  %v2453_v30 = vadd.f32 %v1756_v2, %v225_v51  ;;  %v92_v18 = vld [vmem:[%s4210_s0 + $0x258] sm:$0xff] }
  0x88   :  { %1576 = vst.msk [vmem:[%s4214_s4] sm:$0xff] %vm1575_vm15, %v1447_v63  ;;  %v940_v29 = vpop.permute.xlu1 %939  ;;  %v89_v63 = vld [vmem:[%s4210_s0 + $0x240] sm:$0xff]  ;;  %v867_v51 = vsel %vm482_vm6, 1, %v4278_v46  ;;  %vm484_vm10 = vcmp.gt.f32.partialorder %v2440_v41, 0.0  ;;  %v229_v9 = vmul.f32 %v1761_v3, %v92_v18 }
  0x89   :  { %vm1316_vm7 = vcmp.eq.s32.totalorder %v940_v29, 1  ;;  %v934_v26 = vpop.permute.xlu0 %933  ;;  %1125 = vperm.xlu1 %1714, %v866_v28   ;;  %v227_v28 = vmul.f32 %v1761_v3, %v90_v17  ;;  %v680_v29 = vmul.f32 %v2355_v60, %v551_v24  ;;  %v870_v17 = vsel %vm485_vm8, 1, %v4278_v46 }
  0x8a   :  { %v1450_v54 = vsel %vm1316_vm7, %v676_v53, %v2390_v31  ;;  %vm1314_vm9 = vcmp.eq.s32.totalorder %v934_v26, 1  ;;  %1122 = vperm.xlu0 %1713, %v865_v44   ;;  %v677_v44 = vmul.f32 %v2355_v60, %v548_v21  ;;  %v226_v21 = vmul.f32 %v1761_v3, %v89_v63 }
  0x8b   :  { %1579 = vst.msk [vmem:[%s4214_s4 + $0x18] sm:$0xff] %vm1575_vm15, %v1450_v54  ;;  %v1448_v53 = vsel %vm1314_vm9, %v674_v36, %v2390_v31  ;;  %v2478_v54 = vadd.f32 %v1756_v2, %v224_v20  ;;  %vm487_vm13 = vcmp.gt.f32.partialorder %v2453_v30, 0.0  ;;  %v2530_v24 = vadd.f32 %v1756_v2, %v229_v9 }
  0x8c   :  { %1577 = vst.msk [vmem:[%s4214_s4 + $0x8] sm:$0xff] %vm1575_vm15, %v1448_v53  ;;  %v946_v26 = vpop.permute.xlu1 %945  ;;  %v91_v53 = vld [vmem:[%s4210_s0 + $0x250] sm:$0xff] }
  0x8d   :  { %vm1318_vm11 = vcmp.eq.s32.totalorder %v946_v26, 1  ;;  %v943_v36 = vpop.permute.xlu0 %942  ;;  %1131 = vperm.xlu1 %1714, %v868_v8   ;;  %v2492_v8 = vadd.f32 %v1756_v2, %v227_v28  ;;  %v869_v28 = vsel %vm484_vm10, 1, %v4278_v46  ;;  %vm486_vm14 = vcmp.gt.f32.partialorder %v2478_v54, 0.0 }
  0x8e   :  { %v1452_v20 = vsel %vm1318_vm11, %v678_v11, %v2390_v31  ;;  %vm1317_vm12 = vcmp.eq.s32.totalorder %v943_v36, 1  ;;  %1128 = vperm.xlu0 %1713, %v867_v51   ;;  %v4291_v11 = vsub.f32 %v1830_v33, %v1756_v2  ;;  %v94_v51 = vld [vmem:[%s4210_s0 + $0x268] sm:$0xff]  ;;  %v2519_v33 = vadd.f32 %v1756_v2, %v226_v21  ;;  %v93_v21 = vld [vmem:[%s4210_s0 + $0x260] sm:$0xff] }
  0x8f   :  { %1581 = vst.msk [vmem:[%s4214_s4 + $0x28] sm:$0xff] %vm1575_vm15, %v1452_v20  ;;  %v1451_v63 = vsel %vm1317_vm12, %v677_v44, %v2390_v31  ;;  %v228_v36 = vmul.f32 %v1761_v3, %v91_v53  ;;  %vm489_vm2 = vcmp.gt.f32.partialorder %v2492_v8, 0.0  ;;  %vm491_vm5 = vcmp.gt.f32.partialorder %v2530_v24, 0.0 }
  0x90   :  { %v679_v18 = vmul.f32 %v2355_v60, %v4291_v11  ;;  %1580 = vst.msk [vmem:[%s4214_s4 + $0x20] sm:$0xff] %vm1575_vm15, %v1451_v63  ;;  %v952_v44 = vpop.permute.xlu1 %951  ;;  %4292 = vst [vmem:[#allocation24_spill] sm:$0xff] %v2519_v33  ;;  %v4293_v11 = vsub.f32 %v1844_v40, %v1756_v2  ;;  %v872_v63 = vsel %vm487_vm13, 1, %v4278_v46  ;;  %v231_v40 = vmul.f32 %v1761_v3, %v94_v51  ;;  %v96_v3 = vld [vmem:[%s4210_s0 + $0x278] sm:$0xff] }
  0x91   :  { %vm1320_vm0 = vcmp.eq.s32.totalorder %v952_v44, 1  ;;  %v949_v20 = vpop.permute.xlu0 %948  ;;  %1137 = vperm.xlu1 %1714, %v870_v17   ;;  %v4294_v44 = vsub.f32 %v1849_v42, %v1756_v2  ;;  %vm488_vm3 = vcmp.gt.f32.partialorder %v2519_v33, 0.0  ;;  %v2565_v42 = vld [vmem:[%s4211_s1] ss:$0 sm:$0xff]  ;;  %v95_v17 = vld [vmem:[%s4210_s0 + $0x270] sm:$0xff] }
  0x92   :  { %v682_v26 = vmul.f32 %v2355_v60, %v4293_v11  ;;  %v1454_v53 = vsel %vm1320_vm0, %v680_v29, %v2390_v31  ;;  %vm1319_vm1 = vcmp.eq.s32.totalorder %v949_v20, 1  ;;  %1134 = vperm.xlu0 %1713, %v869_v28   ;;  %v871_v28 = vsel %vm486_vm14, 1, %v4278_v46  ;;  %v2573_v11 = vld [vmem:[%s4212_s2] ss:$0 sm:$0xff] }
  0x93   :  { %1583 = vst.msk [vmem:[%s4214_s4 + $0x38] sm:$0xff] %vm1575_vm15, %v1454_v53  ;;  %v1453_v9 = vsel %vm1319_vm1, %v679_v18, %v2390_v31  ;;  %v681_v29 = vmul.f32 %v2355_v60, %v4294_v44  ;;  %v2568_v20 = vadd.f32 %v2565_v42, %v228_v36  ;;  %v230_v53 = vmul.f32 %v2573_v11, %v93_v21 }
  0x94   :  { %1582 = vst.msk [vmem:[%s4214_s4 + $0x30] sm:$0xff] %vm1575_vm15, %v1453_v9  ;;  %v958_v18 = vpop.permute.xlu1 %957  ;;  %v4295_v44 = vsub.f32 %v1862_v48, %v1756_v2  ;;  %v874_v36 = vsel %vm489_vm2, 1, %v4278_v46  ;;  %v233_v48 = vmul.f32 %v2573_v11, %v96_v3  ;;  %v873_v3 = vsel %vm488_vm3, 1, %v4278_v46 }
  0x95   :  { %vm1322_vm4 = vcmp.eq.s32.totalorder %v958_v18, 1  ;;  %v955_v9 = vpop.permute.xlu0 %954  ;;  %1143 = vperm.xlu1 %1714, %v872_v63   ;;  %v2589_v63 = vadd.f32 %v2565_v42, %v231_v40  ;;  %v98_v18 = vld [vmem:[%s4210_s0 + $0x288] sm:$0xff]  ;;  %v4296_v40 = vsub.f32 %v1867_v50, %v1756_v2  ;;  %vm490_vm7 = vcmp.gt.f32.partialorder %v2568_v20, 0.0 }
  0x96   :  { %v684_v51 = vmul.f32 %v2355_v60, %v4295_v44  ;;  %v1456_v21 = vsel %vm1322_vm4, %v682_v26, %v2390_v31  ;;  %vm1321_vm6 = vcmp.eq.s32.totalorder %v955_v9, 1  ;;  %1140 = vperm.xlu0 %1713, %v871_v28   ;;  %v561_v44 = vsub.f32 %v1916_v10, %v2565_v42 }
  0x97   :  { %1585 = vst.msk [vmem:[%s4214_s4 + $0x48] sm:$0xff] %vm1575_vm15, %v1456_v21  ;;  %v1455_v26 = vsel %vm1321_vm6, %v681_v29, %v2390_v31  ;;  %v683_v28 = vmul.f32 %v2355_v60, %v4296_v40  ;;  %v2617_v29 = vadd.f32 %v2565_v42, %v230_v53  ;;  %v232_v50 = vmul.f32 %v2573_v11, %v95_v17  ;;  %v97_v53 = vld [vmem:[%s4210_s0 + $0x280] sm:$0xff] }
  0x98   :  { %1584 = vst.msk [vmem:[%s4214_s4 + $0x40] sm:$0xff] %vm1575_vm15, %v1455_v26  ;;  %v964_v10 = vpop.permute.xlu1 %963  ;;  %v4297_v40 = vsub.f32 %v1880_v56, %v1756_v2  ;;  %v876_v26 = vsel %vm491_vm5, 1, %v4278_v46  ;;  %v235_v33 = vmul.f32 %v2573_v11, %v98_v18  ;;  %vm493_vm10 = vcmp.gt.f32.partialorder %v2589_v63, 0.0 }
  0x99   :  { %vm1324_vm8 = vcmp.eq.s32.totalorder %v964_v10, 1  ;;  %v961_v21 = vpop.permute.xlu0 %960  ;;  %1149 = vperm.xlu1 %1714, %v874_v36   ;;  %v2634_v56 = vadd.f32 %v2565_v42, %v233_v48  ;;  %v875_v48 = vsel %vm490_vm7, 1, %v4278_v46  ;;  %v100_v10 = vld [vmem:[%s4210_s0 + $0x298] sm:$0xff]  ;;  %vm492_vm11 = vcmp.gt.f32.partialorder %v2617_v29, 0.0 }
  0x9a   :  { %v686_v9 = vmul.f32 %v2355_v60, %v4297_v40  ;;  %v1458_v17 = vsel %vm1324_vm8, %v684_v51, %v2390_v31  ;;  %vm1323_vm9 = vcmp.eq.s32.totalorder %v961_v21, 1  ;;  %1146 = vperm.xlu0 %1713, %v873_v3   ;;  %v4298_v51 = vsub.f32 %v1885_v58, %v1756_v2 }
  0x9b   :  { %1587 = vst.msk [vmem:[%s4214_s4 + $0x58] sm:$0xff] %vm1575_vm15, %v1458_v17  ;;  %v1457_v18 = vsel %vm1323_vm9, %v683_v28, %v2390_v31  ;;  %v2661_v58 = vadd.f32 %v2565_v42, %v232_v50  ;;  %v234_v40 = vmul.f32 %v2573_v11, %v97_v53  ;;  %v2672_v36 = vadd.f32 %v2565_v42, %v235_v33  ;;  %v99_v50 = vld [vmem:[%s4210_s0 + $0x290] sm:$0xff] }
  0x9c   :  { %v685_v3 = vmul.f32 %v2355_v60, %v4298_v51  ;;  %1586 = vst.msk [vmem:[%s4214_s4 + $0x50] sm:$0xff] %vm1575_vm15, %v1457_v18  ;;  %v970_v28 = vpop.permute.xlu1 %969  ;;  %v4299_v51 = vsub.f32 %v1898_v0, %v1756_v2  ;;  %v878_v18 = vsel %vm493_vm10, 1, %v4278_v46  ;;  %vm495_vm14 = vcmp.gt.f32.partialorder %v2634_v56, 0.0 }
  0x9d   :  { %vm1326_vm12 = vcmp.eq.s32.totalorder %v970_v28, 1  ;;  %v967_v17 = vpop.permute.xlu0 %966  ;;  %1155 = vperm.xlu1 %1714, %v876_v26   ;;  %v237_v0 = vmul.f32 %v2573_v11, %v100_v10  ;;  %v565_v26 = vsub.f32 %v1952_v35, %v2565_v42  ;;  %v4300_v28 = vsub.f32 %v1903_v4, %v1756_v2  ;;  %v102_v10 = vld [vmem:[%s4210_s0 + $0x2a8] sm:$0xff] }
  0x9e   :  { %v688_v21 = vmul.f32 %v2355_v60, %v4299_v51  ;;  %v1460_v53 = vsel %vm1326_vm12, %v686_v9, %v2390_v31  ;;  %vm1325_vm13 = vcmp.eq.s32.totalorder %v967_v17, 1  ;;  %1152 = vperm.xlu0 %1713, %v875_v48   ;;  %v877_v48 = vsel %vm492_vm11, 1, %v4278_v46 }
  0x9f   :  { %1589 = vst.msk [vmem:[%s4214_s4 + $0x68] sm:$0xff] %vm1575_vm15, %v1460_v53  ;;  %v1459_v33 = vsel %vm1325_vm13, %v685_v3, %v2390_v31  ;;  %v687_v9 = vmul.f32 %v2355_v60, %v4300_v28  ;;  %vm494_vm0 = vcmp.gt.f32.partialorder %v2661_v58, 0.0  ;;  %v2705_v2 = vadd.f32 %v2565_v42, %v234_v40 }
  0xa0   :  { %1588 = vst.msk [vmem:[%s4214_s4 + $0x60] sm:$0xff] %vm1575_vm15, %v1459_v33  ;;  %v976_v3 = vpop.permute.xlu1 %975  ;;  %v236_v4 = vmul.f32 %v2573_v11, %v99_v50  ;;  %v690_v53 = vmul.f32 %v2355_v60, %v561_v44  ;;  %v880_v28 = vsel %vm495_vm14, 1, %v4278_v46  ;;  %vm497_vm2 = vcmp.gt.f32.partialorder %v2672_v36, 0.0  ;;  %v101_v33 = vld [vmem:[%s4210_s0 + $0x2a0] sm:$0xff]  ;;  %v104_v44 = vld [vmem:[%s4210_s0 + $0x2b8] sm:$0xff] }
  0xa1   :  { %vm1328_vm1 = vcmp.eq.s32.totalorder %v976_v3, 1  ;;  %v973_v51 = vpop.permute.xlu0 %972  ;;  %1161 = vperm.xlu1 %1714, %v878_v18   ;;  %v2718_v50 = vadd.f32 %v2565_v42, %v237_v0  ;;  %v239_v18 = vmul.f32 %v2573_v11, %v102_v10  ;;  %v567_v3 = vsub.f32 %v1970_v45, %v2565_v42 }
  0xa2   :  { %v1462_v40 = vsel %vm1328_vm1, %v688_v21, %v2390_v31  ;;  %vm1327_vm3 = vcmp.eq.s32.totalorder %v973_v51, 1  ;;  %1158 = vperm.xlu0 %1713, %v877_v48   ;;  %v4301_v0 = vsub.f32 %v1921_v12, %v2565_v42  ;;  %v879_v10 = vsel %vm494_vm0, 1, %v4278_v46 }
  0xa3   :  { %1591 = vst.msk [vmem:[%s4214_s4 + $0x78] sm:$0xff] %vm1575_vm15, %v1462_v40  ;;  %v1461_v21 = vsel %vm1327_vm3, %v687_v9, %v2390_v31  ;;  %vm496_vm4 = vcmp.gt.f32.partialorder %v2705_v2, 0.0  ;;  %v2746_v9 = vadd.f32 %v2565_v42, %v236_v4  ;;  %v238_v12 = vmul.f32 %v2573_v11, %v101_v33  ;;  %v103_v4 = vld [vmem:[%s4210_s0 + $0x2b0] sm:$0xff] }
  0xa4   :  { %v689_v48 = vmul.f32 %v2355_v60, %v4301_v0  ;;  %1590 = vst.msk [vmem:[%s4214_s4 + $0x70] sm:$0xff] %vm1575_vm15, %v1461_v21  ;;  %v982_v45 = vpop.permute.xlu1 %981  ;;  %v4302_v0 = vsub.f32 %v1934_v23, %v2565_v42  ;;  %v882_v21 = vsel %vm497_vm2, 1, %v4278_v46  ;;  %v241_v17 = vmul.f32 %v2573_v11, %v104_v44 }
  0xa5   :  { %vm1330_vm5 = vcmp.eq.s32.totalorder %v982_v45, 1  ;;  %v979_v40 = vpop.permute.xlu0 %978  ;;  %1167 = vperm.xlu1 %1714, %v880_v28   ;;  %vm499_vm7 = vcmp.gt.f32.partialorder %v2718_v50, 0.0  ;;  %v2763_v23 = vadd.f32 %v2565_v42, %v239_v18  ;;  %v569_v28 = vsub.f32 %v1988_v55, %v2565_v42  ;;  %v106_v45 = vld [vmem:[%s4210_s0 + $0x2c8] sm:$0xff] }
  0xa6   :  { %v692_v51 = vmul.f32 %v2355_v60, %v4302_v0  ;;  %v1464_v33 = vsel %vm1330_vm5, %v690_v53, %v2390_v31  ;;  %vm1329_vm6 = vcmp.eq.s32.totalorder %v979_v40, 1  ;;  %1164 = vperm.xlu0 %1713, %v879_v10   ;;  %v4303_v53 = vsub.f32 %v1939_v27, %v2565_v42 }
  0xa7   :  { %1593 = vst.msk [vmem:[%s4214_s4 + $0x88] sm:$0xff] %vm1575_vm15, %v1464_v33  ;;  %v1463_v44 = vsel %vm1329_vm6, %v689_v48, %v2390_v31  ;;  %v881_v18 = vsel %vm496_vm4, 1, %v4278_v46  ;;  %vm498_vm8 = vcmp.gt.f32.partialorder %v2746_v9, 0.0  ;;  %v2790_v27 = vadd.f32 %v2565_v42, %v238_v12  ;;  %v105_v12 = vld [vmem:[%s4210_s0 + $0x2c0] sm:$0xff] }
  0xa8   :  { %v691_v10 = vmul.f32 %v2355_v60, %v4303_v53  ;;  %1592 = vst.msk [vmem:[%s4214_s4 + $0x80] sm:$0xff] %vm1575_vm15, %v1463_v44  ;;  %v988_v48 = vpop.permute.xlu1 %987  ;;  %v240_v0 = vmul.f32 %v2573_v11, %v103_v4  ;;  %v694_v53 = vmul.f32 %v2355_v60, %v565_v26  ;;  %v884_v44 = vsel %vm499_vm7, 1, %v4278_v46 }
  0xa9   :  { %vm1332_vm9 = vcmp.eq.s32.totalorder %v988_v48, 1  ;;  %v985_v33 = vpop.permute.xlu0 %984  ;;  %1173 = vperm.xlu1 %1714, %v882_v21   ;;  %v2801_v40 = vadd.f32 %v2565_v42, %v241_v17  ;;  %vm501_vm11 = vcmp.gt.f32.partialorder %v2763_v23, 0.0  ;;  %v243_v35 = vmul.f32 %v2573_v11, %v106_v45  ;;  %v108_v45 = vld [vmem:[%s4210_s0 + $0x2d8] sm:$0xff] }
  0xaa   :  { %v1466_v4 = vsel %vm1332_vm9, %v692_v51, %v2390_v31  ;;  %vm1331_vm10 = vcmp.eq.s32.totalorder %v985_v33, 1  ;;  %1170 = vperm.xlu0 %1713, %v881_v18   ;;  %v571_v26 = vsub.f32 %v2006_v5, %v2565_v42  ;;  %v4304_v21 = vsub.f32 %v1957_v37, %v2565_v42 }
  0xab   :  { %1595 = vst.msk [vmem:[%s4214_s4 + $0x98] sm:$0xff] %vm1575_vm15, %v1466_v4  ;;  %v1465_v17 = vsel %vm1331_vm10, %v691_v10, %v2390_v31  ;;  %v883_v18 = vsel %vm498_vm8, 1, %v4278_v46  ;;  %vm500_vm12 = vcmp.gt.f32.partialorder %v2790_v27, 0.0  ;;  %v2834_v37 = vadd.f32 %v2565_v42, %v240_v0 }
  0xac   :  { %v693_v51 = vmul.f32 %v2355_v60, %v4304_v21  ;;  %1594 = vst.msk [vmem:[%s4214_s4 + $0x90] sm:$0xff] %vm1575_vm15, %v1465_v17  ;;  %v994_v10 = vpop.permute.xlu1 %993  ;;  %v242_v33 = vmul.f32 %v2573_v11, %v105_v12  ;;  %v696_v21 = vmul.f32 %v2355_v60, %v567_v3  ;;  %v886_v48 = vsel %vm501_vm11, 1, %v4278_v46  ;;  %v107_v17 = vld [vmem:[%s4210_s0 + $0x2d0] sm:$0xff]  ;;  %v110_v3 = vld [vmem:[%s4210_s0 + $0x2e8] sm:$0xff] }
  0xad   :  { %vm1334_vm13 = vcmp.eq.s32.totalorder %v994_v10, 1  ;;  %v991_v4 = vpop.permute.xlu0 %990  ;;  %1179 = vperm.xlu1 %1714, %v884_v44   ;;  %vm503_vm14 = vcmp.gt.f32.partialorder %v2801_v40, 0.0  ;;  %v2847_v12 = vadd.f32 %v2565_v42, %v243_v35  ;;  %v245_v44 = vmul.f32 %v2573_v11, %v108_v45 }
  0xae   :  { %v1468_v0 = vsel %vm1334_vm13, %v694_v53, %v2390_v31  ;;  %vm1333_vm0 = vcmp.eq.s32.totalorder %v991_v4, 1  ;;  %1176 = vperm.xlu0 %1713, %v883_v18   ;;  %v573_v10 = vsub.f32 %v2024_v16, %v2565_v42  ;;  %v4305_v35 = vsub.f32 %v1975_v47, %v2565_v42 }
  0xaf   :  { %1597 = vst.msk [vmem:[%s4214_s4 + $0xa8] sm:$0xff] %vm1575_vm15, %v1468_v0  ;;  %v1467_v53 = vsel %vm1333_vm0, %v693_v51, %v2390_v31  ;;  %v885_v45 = vsel %vm500_vm12, 1, %v4278_v46  ;;  %vm502_vm1 = vcmp.gt.f32.partialorder %v2834_v37, 0.0  ;;  %v2875_v51 = vadd.f32 %v2565_v42, %v242_v33  ;;  %v109_v33 = vld [vmem:[%s4210_s0 + $0x2e0] sm:$0xff] }
  0xb0   :  { %v695_v18 = vmul.f32 %v2355_v60, %v4305_v35  ;;  %1596 = vst.msk [vmem:[%s4214_s4 + $0xa0] sm:$0xff] %vm1575_vm15, %v1467_v53  ;;  %v1000_v16 = vpop.permute.xlu1 %999  ;;  %v244_v47 = vmul.f32 %v2573_v11, %v107_v17  ;;  %v698_v35 = vmul.f32 %v2355_v60, %v569_v28  ;;  %v888_v53 = vsel %vm503_vm14, 1, %v4278_v46 }
  0xb1   :  { %vm1336_vm2 = vcmp.eq.s32.totalorder %v1000_v16, 1  ;;  %v997_v0 = vpop.permute.xlu0 %996  ;;  %1185 = vperm.xlu1 %1714, %v886_v48   ;;  %v247_v4 = vmul.f32 %v2573_v11, %v110_v3  ;;  %vm505_vm4 = vcmp.gt.f32.partialorder %v2847_v12, 0.0  ;;  %v2892_v55 = vadd.f32 %v2565_v42, %v245_v44 }
  0xb2   :  { %v1470_v17 = vsel %vm1336_vm2, %v696_v21, %v2390_v31  ;;  %vm1335_vm3 = vcmp.eq.s32.totalorder %v997_v0, 1  ;;  %1182 = vperm.xlu0 %1713, %v885_v45   ;;  %v575_v28 = vsub.f32 %v2042_v34, %v2565_v42  ;;  %v4306_v21 = vsub.f32 %v1993_v59, %v2565_v42  ;;  %v112_v45 = vld [vmem:[%s4210_s0 + $0x2f8] sm:$0xff] }
  0xb3   :  { %1599 = vst.msk [vmem:[%s4214_s4 + $0xb8] sm:$0xff] %vm1575_vm15, %v1470_v17  ;;  %v1469_v48 = vsel %vm1335_vm3, %v695_v18, %v2390_v31  ;;  %v887_v44 = vsel %vm502_vm1, 1, %v4278_v46  ;;  %vm504_vm5 = vcmp.gt.f32.partialorder %v2875_v51, 0.0  ;;  %v2919_v59 = vadd.f32 %v2565_v42, %v244_v47  ;;  %v111_v47 = vld [vmem:[%s4210_s0 + $0x2f0] sm:$0xff] }
  0xb4   :  { %v697_v3 = vmul.f32 %v2355_v60, %v4306_v21  ;;  %1598 = vst.msk [vmem:[%s4214_s4 + $0xb0] sm:$0xff] %vm1575_vm15, %v1469_v48  ;;  %v1006_v18 = vpop.permute.xlu1 %1005  ;;  %v246_v0 = vmul.f32 %v2573_v11, %v109_v33  ;;  %v700_v21 = vmul.f32 %v2355_v60, %v571_v26  ;;  %v890_v48 = vsel %vm505_vm4, 1, %v4278_v46 }
  0xb5   :  { %vm1338_vm6 = vcmp.eq.s32.totalorder %v1006_v18, 1  ;;  %v1003_v17 = vpop.permute.xlu0 %1002  ;;  %1191 = vperm.xlu1 %1714, %v888_v53   ;;  %v2930_v16 = vadd.f32 %v2565_v42, %v247_v4  ;;  %vm507_vm8 = vcmp.gt.f32.partialorder %v2892_v55, 0.0  ;;  %v249_v5 = vmul.f32 %v2573_v11, %v112_v45  ;;  %v114_v45 = vld [vmem:[%s4210_s0 + $0x308] sm:$0xff] }
  0xb6   :  { %v1472_v33 = vsel %vm1338_vm6, %v698_v35, %v2390_v31  ;;  %vm1337_vm7 = vcmp.eq.s32.totalorder %v1003_v17, 1  ;;  %1188 = vperm.xlu0 %1713, %v887_v44   ;;  %v577_v26 = vsub.f32 %v2060_v49, %v2565_v42  ;;  %v4307_v53 = vsub.f32 %v2011_v7, %v2565_v42 }
  0xb7   :  { %1601 = vst.msk [vmem:[%s4214_s4 + $0xc8] sm:$0xff] %vm1575_vm15, %v1472_v33  ;;  %v1471_v4 = vsel %vm1337_vm7, %v697_v3, %v2390_v31  ;;  %v889_v44 = vsel %vm504_vm5, 1, %v4278_v46  ;;  %vm506_vm9 = vcmp.gt.f32.partialorder %v2919_v59, 0.0  ;;  %v2963_v7 = vadd.f32 %v2565_v42, %v246_v0 }
  0xb8   :  { %v699_v35 = vmul.f32 %v2355_v60, %v4307_v53  ;;  %1600 = vst.msk [vmem:[%s4214_s4 + $0xc0] sm:$0xff] %vm1575_vm15, %v1471_v4  ;;  %v1012_v3 = vpop.permute.xlu1 %1011  ;;  %v248_v17 = vmul.f32 %v2573_v11, %v111_v47  ;;  %v702_v53 = vmul.f32 %v2355_v60, %v573_v10  ;;  %v892_v18 = vsel %vm507_vm8, 1, %v4278_v46  ;;  %v113_v4 = vld [vmem:[%s4210_s0 + $0x300] sm:$0xff]  ;;  %v116_v10 = vld [vmem:[%s4210_s0 + $0x318] sm:$0xff] }
  0xb9   :  { %vm1340_vm10 = vcmp.eq.s32.totalorder %v1012_v3, 1  ;;  %v1009_v33 = vpop.permute.xlu0 %1008  ;;  %1197 = vperm.xlu1 %1714, %v890_v48   ;;  %vm509_vm11 = vcmp.gt.f32.partialorder %v2930_v16, 0.0  ;;  %v2976_v47 = vadd.f32 %v2565_v42, %v249_v5  ;;  %v251_v48 = vmul.f32 %v2573_v11, %v114_v45 }
  0xba   :  { %v1474_v0 = vsel %vm1340_vm10, %v700_v21, %v2390_v31  ;;  %vm1339_vm12 = vcmp.eq.s32.totalorder %v1009_v33, 1  ;;  %1194 = vperm.xlu0 %1713, %v889_v44   ;;  %v579_v3 = vsub.f32 %v2078_v62, %v2565_v42  ;;  %v4308_v5 = vsub.f32 %v2029_v22, %v2565_v42 }
  0xbb   :  { %1603 = vst.msk [vmem:[%s4214_s4 + $0xd8] sm:$0xff] %vm1575_vm15, %v1474_v0  ;;  %v1473_v21 = vsel %vm1339_vm12, %v699_v35, %v2390_v31  ;;  %v891_v45 = vsel %vm506_vm9, 1, %v4278_v46  ;;  %vm508_vm13 = vcmp.gt.f32.partialorder %v2963_v7, 0.0  ;;  %v3004_v35 = vadd.f32 %v2565_v42, %v248_v17  ;;  %v115_v17 = vld [vmem:[%s4210_s0 + $0x310] sm:$0xff] }
  0xbc   :  { %v701_v44 = vmul.f32 %v2355_v60, %v4308_v5  ;;  %1602 = vst.msk [vmem:[%s4214_s4 + $0xd0] sm:$0xff] %vm1575_vm15, %v1473_v21  ;;  %v1018_v62 = vpop.permute.xlu1 %1017  ;;  %v250_v22 = vmul.f32 %v2573_v11, %v113_v4  ;;  %v704_v5 = vmul.f32 %v2355_v60, %v575_v28  ;;  %v894_v21 = vsel %vm509_vm11, 1, %v4278_v46 }
  0xbd   :  { %vm1342_vm14 = vcmp.eq.s32.totalorder %v1018_v62, 1  ;;  %v1015_v0 = vpop.permute.xlu0 %1014  ;;  %1203 = vperm.xlu1 %1714, %v892_v18   ;;  %v253_v33 = vmul.f32 %v2573_v11, %v116_v10  ;;  %vm511_vm1 = vcmp.gt.f32.partialorder %v2976_v47, 0.0  ;;  %v3021_v34 = vadd.f32 %v2565_v42, %v251_v48 }
  0xbe   :  { %v1476_v4 = vsel %vm1342_vm14, %v702_v53, %v2390_v31  ;;  %vm1341_vm0 = vcmp.eq.s32.totalorder %v1015_v0, 1  ;;  %1200 = vperm.xlu0 %1713, %v891_v45   ;;  %v581_v28 = vsub.f32 %v2096_v15, %v2565_v42  ;;  %v4309_v53 = vsub.f32 %v2047_v38, %v2565_v42  ;;  %v118_v45 = vld [vmem:[%s4210_s0 + $0x328] sm:$0xff] }
  0xbf   :  { %1605 = vst.msk [vmem:[%s4214_s4 + $0xe8] sm:$0xff] %vm1575_vm15, %v1476_v4  ;;  %v1475_v18 = vsel %vm1341_vm0, %v701_v44, %v2390_v31  ;;  %v893_v48 = vsel %vm508_vm13, 1, %v4278_v46  ;;  %vm510_vm2 = vcmp.gt.f32.partialorder %v3004_v35, 0.0  ;;  %v3048_v38 = vadd.f32 %v2565_v42, %v250_v22  ;;  %v117_v22 = vld [vmem:[%s4210_s0 + $0x320] sm:$0xff] }
  0xc0   :  { %v703_v10 = vmul.f32 %v2355_v60, %v4309_v53  ;;  %1604 = vst.msk [vmem:[%s4214_s4 + $0xe0] sm:$0xff] %vm1575_vm15, %v1475_v18  ;;  %v1024_v44 = vpop.permute.xlu1 %1023  ;;  %v252_v0 = vmul.f32 %v2573_v11, %v115_v17  ;;  %v706_v53 = vmul.f32 %v2355_v60, %v577_v26  ;;  %v896_v18 = vsel %vm511_vm1, 1, %v4278_v46 }
  0xc1   :  { %vm1344_vm3 = vcmp.eq.s32.totalorder %v1024_v44, 1  ;;  %v1021_v4 = vpop.permute.xlu0 %1020  ;;  %1209 = vperm.xlu1 %1714, %v894_v21   ;;  %v3059_v62 = vadd.f32 %v2565_v42, %v253_v33  ;;  %vm513_vm5 = vcmp.gt.f32.partialorder %v3021_v34, 0.0  ;;  %v255_v49 = vmul.f32 %v2573_v11, %v118_v45  ;;  %v120_v45 = vld [vmem:[%s4210_s0 + $0x338] sm:$0xff] }
  0xc2   :  { %v1478_v17 = vsel %vm1344_vm3, %v704_v5, %v2390_v31  ;;  %vm1343_vm4 = vcmp.eq.s32.totalorder %v1021_v4, 1  ;;  %1206 = vperm.xlu0 %1713, %v893_v48   ;;  %v583_v26 = vsub.f32 %v2114_v39, %v2565_v42  ;;  %v4310_v21 = vsub.f32 %v2065_v52, %v2565_v42 }
  0xc3   :  { %1607 = vst.msk [vmem:[%s4214_s4 + $0xf8] sm:$0xff] %vm1575_vm15, %v1478_v17  ;;  %v1477_v33 = vsel %vm1343_vm4, %v703_v10, %v2390_v31  ;;  %v895_v48 = vsel %vm510_vm2, 1, %v4278_v46  ;;  %vm512_vm6 = vcmp.gt.f32.partialorder %v3048_v38, 0.0  ;;  %v3092_v52 = vadd.f32 %v2565_v42, %v252_v0 }
  0xc4   :  { %v705_v5 = vmul.f32 %v2355_v60, %v4310_v21  ;;  %1606 = vst.msk [vmem:[%s4214_s4 + $0xf0] sm:$0xff] %vm1575_vm15, %v1477_v33  ;;  %v1030_v10 = vpop.permute.xlu1 %1029  ;;  %v254_v4 = vmul.f32 %v2573_v11, %v117_v22  ;;  %v708_v21 = vmul.f32 %v2355_v60, %v579_v3  ;;  %v898_v44 = vsel %vm513_vm5, 1, %v4278_v46  ;;  %v119_v33 = vld [vmem:[%s4210_s0 + $0x330] sm:$0xff]  ;;  %v122_v3 = vld [vmem:[%s4210_s0 + $0x348] sm:$0xff] }
  0xc5   :  { %4311 = vst [vmem:[#allocation25_spill] sm:$0xff] %v3092_v52  ;;  %vm1346_vm7 = vcmp.eq.s32.totalorder %v1030_v10, 1  ;;  %v1027_v17 = vpop.permute.xlu0 %1026  ;;  %1215 = vperm.xlu1 %1714, %v896_v18   ;;  %vm515_vm8 = vcmp.gt.f32.partialorder %v3059_v62, 0.0  ;;  %v3105_v22 = vadd.f32 %v2565_v42, %v255_v49  ;;  %v257_v18 = vmul.f32 %v2573_v11, %v120_v45 }
  0xc6   :  { %v1480_v0 = vsel %vm1346_vm7, %v706_v53, %v2390_v31  ;;  %vm1345_vm9 = vcmp.eq.s32.totalorder %v1027_v17, 1  ;;  %1212 = vperm.xlu0 %1713, %v895_v48   ;;  %v585_v10 = vsub.f32 %v2132_v57, %v2565_v42  ;;  %v4313_v49 = vsub.f32 %v2083_v1, %v2565_v42 }
  0xc7   :  { %4312 = vst [vmem:[#allocation26_spill] sm:$0xff] %v3105_v22  ;;  %1609 = vst.msk [vmem:[%s4214_s4 + $0x108] sm:$0xff] %vm1575_vm15, %v1480_v0  ;;  %v1479_v53 = vsel %vm1345_vm9, %v705_v5, %v2390_v31  ;;  %v897_v45 = vsel %vm512_vm6, 1, %v4278_v46  ;;  %vm514_vm10 = vcmp.gt.f32.partialorder %v3092_v52, 0.0  ;;  %v3133_v5 = vadd.f32 %v2565_v42, %v254_v4  ;;  %v121_v4 = vld [vmem:[%s4210_s0 + $0x340] sm:$0xff] }
  0xc8   :  { %v707_v48 = vmul.f32 %v2355_v60, %v4313_v49  ;;  %1608 = vst.msk [vmem:[%s4214_s4 + $0x100] sm:$0xff] %vm1575_vm15, %v1479_v53  ;;  %v1036_v57 = vpop.permute.xlu1 %1035  ;;  %v256_v1 = vmul.f32 %v2573_v11, %v119_v33  ;;  %v710_v49 = vmul.f32 %v2355_v60, %v581_v28  ;;  %v900_v53 = vsel %vm515_vm8, 1, %v4278_v46  ;;  %v4316_v28 = vld [vmem:[#allocation2_spill] sm:$0xff] }
  0xc9   :  { %4314 = vst [vmem:[#allocation27_spill] sm:$0xff] %v3133_v5  ;;  %vm1348_vm11 = vcmp.eq.s32.totalorder %v1036_v57, 1  ;;  %v1033_v0 = vpop.permute.xlu0 %1032  ;;  %1221 = vperm.xlu1 %1714, %v898_v44   ;;  %v259_v17 = vmul.f32 %v2573_v11, %v122_v3  ;;  %vm517_vm13 = vcmp.gt.f32.partialorder %v3105_v22, 0.0  ;;  %v3150_v15 = vadd.f32 %v2565_v42, %v257_v18  ;;  %v124_v57 = vld [vmem:[%s4210_s0 + $0x358] sm:$0xff] }
  0xca   :  { %v1482_v33 = vsel %vm1348_vm11, %v708_v21, %v2390_v31  ;;  %vm1347_vm12 = vcmp.eq.s32.totalorder %v1033_v0, 1  ;;  %1218 = vperm.xlu0 %1713, %v897_v45   ;;  %v4317_v21 = vsub.f32 %v2101_v25, %v2565_v42  ;;  %v899_v18 = vsel %vm514_vm10, 1, %v4278_v46  ;;  %v4318_v0 = vld [vmem:[#allocation3_spill] sm:$0xff] }
  0xcb   :  { %4315 = vst [vmem:[#allocation28_spill] sm:$0xff] %v3150_v15  ;;  %1611 = vst.msk [vmem:[%s4214_s4 + $0x118] sm:$0xff] %vm1575_vm15, %v1482_v33  ;;  %v1481_v3 = vsel %vm1347_vm12, %v707_v48, %v2390_v31  ;;  %vm516_vm14 = vcmp.gt.f32.partialorder %v3133_v5, 0.0  ;;  %v3177_v25 = vadd.f32 %v2565_v42, %v256_v1  ;;  %v258_v33 = vmul.f32 %v2573_v11, %v121_v4  ;;  %v123_v1 = vld [vmem:[%s4210_s0 + $0x350] sm:$0xff] }
  0xcc   :  { %v709_v45 = vmul.f32 %v2355_v60, %v4317_v21  ;;  %1610 = vst.msk [vmem:[%s4214_s4 + $0x110] sm:$0xff] %vm1575_vm15, %v1481_v3  ;;  %v1042_v48 = vpop.permute.xlu1 %1041  ;;  %v712_v44 = vmul.f32 %v2355_v60, %v583_v26  ;;  %v902_v3 = vsel %vm517_vm13, 1, %v4278_v46  ;;  %v3188_v52 = vadd.f32 %v2565_v42, %v259_v17  ;;  %v4321_v26 = vld [vmem:[#allocation4_spill] sm:$0xff] }
  0xcd   :  { %4319 = vst [vmem:[#allocation2_spill] sm:$0xff] %v3177_v25  ;;  %vm1350_vm0 = vcmp.eq.s32.totalorder %v1042_v48, 1  ;;  %v1039_v21 = vpop.permute.xlu0 %1038  ;;  %1227 = vperm.xlu1 %1714, %v900_v53   ;;  %vm519_vm2 = vcmp.gt.f32.partialorder %v3150_v15, 0.0  ;;  %v261_v39 = vmul.f32 %v2573_v11, %v124_v57  ;;  %v4322_v48 = vsub.f32 %v2119_v43, %v2565_v42  ;;  %v126_v57 = vld [vmem:[%s4210_s0 + $0x368] sm:$0xff] }
  0xce   :  { %4320 = vst [vmem:[#allocation3_spill] sm:$0xff] %v3188_v52  ;;  %v1484_v4 = vsel %vm1350_vm0, %v710_v49, %v2390_v31  ;;  %vm1349_vm1 = vcmp.eq.s32.totalorder %v1039_v21, 1  ;;  %1224 = vperm.xlu0 %1713, %v899_v18   ;;  %v901_v18 = vsel %vm516_vm14, 1, %v4278_v46  ;;  %v4323_v21 = vld [vmem:[#allocation5_spill] sm:$0xff]  ;;  %vm518_vm3 = vcmp.gt.f32.partialorder %v3177_v25, 0.0 }
  0xcf   :  { %1613 = vst.msk [vmem:[%s4214_s4 + $0x128] sm:$0xff] %vm1575_vm15, %v1484_v4  ;;  %v1483_v17 = vsel %vm1349_vm1, %v709_v45, %v2390_v31  ;;  %v711_v49 = vmul.f32 %v2355_v60, %v4322_v48  ;;  %v3221_v43 = vadd.f32 %v2565_v42, %v258_v33  ;;  %v260_v4 = vmul.f32 %v2573_v11, %v123_v1 }
  0xd0   :  { %1612 = vst.msk [vmem:[%s4214_s4 + $0x120] sm:$0xff] %vm1575_vm15, %v1483_v17  ;;  %v1048_v45 = vpop.permute.xlu1 %1047  ;;  %v714_v5 = vmul.f32 %v2355_v60, %v585_v10  ;;  %v904_v53 = vsel %vm519_vm2, 1, %v4278_v46  ;;  %vm521_vm5 = vcmp.gt.f32.partialorder %v3188_v52, 0.0  ;;  %v125_v17 = vld [vmem:[%s4210_s0 + $0x360] sm:$0xff]  ;;  %v3234_v1 = vadd.f32 %v2565_v42, %v261_v39  ;;  %v128_v10 = vld [vmem:[%s4210_s0 + $0x378] sm:$0xff] }
  0xd1   :  { %4324 = vst [vmem:[#allocation4_spill] sm:$0xff] %v3221_v43  ;;  %vm1352_vm4 = vcmp.eq.s32.totalorder %v1048_v45, 1  ;;  %v1045_v48 = vpop.permute.xlu0 %1044  ;;  %1233 = vperm.xlu1 %1714, %v902_v3   ;;  %v263_v3 = vmul.f32 %v2573_v11, %v126_v57  ;;  %v4326_v45 = vld [vmem:[#allocation6_spill] sm:$0xff]  ;;  %v4327_v39 = vsub.f32 %v2137_v61, %v2565_v42  ;;  %v903_v57 = vsel %vm518_vm3, 1, %v4278_v46 }
  0xd2   :  { %v1486_v33 = vsel %vm1352_vm4, %v712_v44, %v2390_v31  ;;  %vm1351_vm6 = vcmp.eq.s32.totalorder %v1045_v48, 1  ;;  %1230 = vperm.xlu0 %1713, %v901_v18   ;;  %4325 = vst [vmem:[#allocation5_spill] sm:$0xff] %v3234_v1  ;;  %v4328_v48 = vld [vmem:[#allocation7_spill] sm:$0xff]  ;;  %vm520_vm7 = vcmp.gt.f32.partialorder %v3221_v43, 0.0  ;;  %v262_v61 = vmul.f32 %v2573_v11, %v125_v17 }
  0xd3   :  { %1615 = vst.msk [vmem:[%s4214_s4 + $0x138] sm:$0xff] %vm1575_vm15, %v1486_v33  ;;  %v1485_v44 = vsel %vm1351_vm6, %v711_v49, %v2390_v31  ;;  %v713_v18 = vmul.f32 %v2355_v60, %v4327_v39  ;;  %v3262_v49 = vadd.f32 %v2565_v42, %v260_v4  ;;  %v4330_v15 = vsub.f32 %v4316_v28, %v2565_v42  ;;  %v127_v4 = vld [vmem:[%s4210_s0 + $0x370] sm:$0xff] }
  0xd4   :  { %1614 = vst.msk [vmem:[%s4214_s4 + $0x130] sm:$0xff] %vm1575_vm15, %v1485_v44  ;;  %v1054_v33 = vpop.permute.xlu1 %1053  ;;  %v906_v44 = vsel %vm521_vm5, 1, %v4278_v46  ;;  %v265_v25 = vmul.f32 %v2573_v11, %v128_v10  ;;  %vm523_vm10 = vcmp.gt.f32.partialorder %v3234_v1, 0.0  ;;  %v3279_v28 = vadd.f32 %v2565_v42, %v263_v3 }
  0xd5   :  { %4329 = vst [vmem:[#allocation6_spill] sm:$0xff] %v3262_v49  ;;  %vm1354_vm8 = vcmp.eq.s32.totalorder %v1054_v33, 1  ;;  %v1051_v39 = vpop.permute.xlu0 %1050  ;;  %1239 = vperm.xlu1 %1714, %v904_v53   ;;  %v716_v22 = vmul.f32 %v2355_v60, %v4330_v15  ;;  %v4332_v15 = vld [vmem:[#allocation8_spill] sm:$0xff]  ;;  %v905_v3 = vsel %vm520_vm7, 1, %v4278_v46  ;;  %v130_v33 = vld [vmem:[%s4210_s0 + $0x388] sm:$0xff]  ;;  %vm522_vm11 = vcmp.gt.f32.partialorder %v3262_v49, 0.0 }
  0xd6   :  { %v1488_v17 = vsel %vm1354_vm8, %v714_v5, %v2390_v31  ;;  %vm1353_vm9 = vcmp.eq.s32.totalorder %v1051_v39, 1  ;;  %1236 = vperm.xlu0 %1713, %v903_v57   ;;  %4331 = vst [vmem:[#allocation7_spill] sm:$0xff] %v3279_v28  ;;  %v593_v53 = vsub.f32 %v4332_v15, %v2565_v42  ;;  %v4333_v5 = vsub.f32 %v4318_v0, %v2565_v42  ;;  %v4334_v39 = vld [vmem:[#allocation9_spill] sm:$0xff] }
  0xd7   :  { %1617 = vst.msk [vmem:[%s4214_s4 + $0x148] sm:$0xff] %vm1575_vm15, %v1488_v17  ;;  %v1487_v10 = vsel %vm1353_vm9, %v713_v18, %v2390_v31  ;;  %v3306_v0 = vadd.f32 %v2565_v42, %v262_v61  ;;  %v264_v18 = vmul.f32 %v2573_v11, %v127_v4  ;;  %v3317_v43 = vadd.f32 %v2565_v42, %v265_v25  ;;  %v129_v61 = vld [vmem:[%s4210_s0 + $0x380] sm:$0xff] }
  0xd8   :  { %v715_v57 = vmul.f32 %v2355_v60, %v4333_v5  ;;  %1616 = vst.msk [vmem:[%s4214_s4 + $0x140] sm:$0xff] %vm1575_vm15, %v1487_v10  ;;  %v1060_v31 = vpop.permute.xlu1 %1059  ;;  %v4336_v5 = vsub.f32 %v4321_v26, %v2565_v42  ;;  %v908_v10 = vsel %vm523_vm10, 1, %v4278_v46  ;;  %vm525_vm14 = vcmp.gt.f32.partialorder %v3279_v28, 0.0  ;;  %v4337_v25 = vld [vmem:[#allocation10_spill] sm:$0xff]  ;;  %v4342_v28 = vld [vmem:[#allocation12_spill] sm:$0xff] }
  0xd9   :  { %4335 = vst [vmem:[#allocation8_spill] sm:$0xff] %v3306_v0  ;;  %vm1356_vm12 = vcmp.eq.s32.totalorder %v1060_v31, 1  ;;  %v1057_v17 = vpop.permute.xlu0 %1056  ;;  %1245 = vperm.xlu1 %1714, %v906_v44   ;;  %v3325_v44 = vld [vmem:[%s4213_s3] ss:$0 sm:$0xff]  ;;  %v267_v4 = vmul.f32 %v2573_v11, %v130_v33  ;;  %v595_v31 = vsub.f32 %v4337_v25, %v2565_v42  ;;  %v4338_v1 = vsub.f32 %v4323_v21, %v2565_v42  ;;  %v132_v33 = vld [vmem:[%s4210_s0 + $0x398] sm:$0xff] }
  0xda   :  { %v718_v15 = vmul.f32 %v2355_v60, %v4336_v5  ;;  %v1490_v26 = vsel %vm1356_vm12, %v716_v22, %v3325_v44  ;;  %vm1355_vm13 = vcmp.eq.s32.totalorder %v1057_v17, 1  ;;  %1242 = vperm.xlu0 %1713, %v905_v3   ;;  %v907_v3 = vsel %vm522_vm11, 1, %v4278_v46  ;;  %v4339_v17 = vld [vmem:[#allocation11_spill] sm:$0xff] }
  0xdb   :  { %1619 = vst.msk [vmem:[%s4214_s4 + $0x158] sm:$0xff] %vm1575_vm15, %v1490_v26  ;;  %v1489_v5 = vsel %vm1355_vm13, %v715_v57, %v3325_v44  ;;  %v717_v22 = vmul.f32 %v2355_v60, %v4338_v1  ;;  %vm524_vm0 = vcmp.gt.f32.partialorder %v3306_v0, 0.0  ;;  %v3355_v21 = vadd.f32 %v2565_v42, %v264_v18  ;;  %v131_v18 = vld [vmem:[%s4210_s0 + $0x390] sm:$0xff] }
  0xdc   :  { %1618 = vst.msk [vmem:[%s4214_s4 + $0x150] sm:$0xff] %vm1575_vm15, %v1489_v5  ;;  %v1066_v57 = vpop.permute.xlu1 %1065  ;;  %v266_v1 = vmul.f32 %v2573_v11, %v129_v61  ;;  %v4340_v49 = vsub.f32 %v4326_v45, %v2565_v42  ;;  %v910_v5 = vsel %vm525_vm14, 1, %v4278_v46  ;;  %vm527_vm2 = vcmp.gt.f32.partialorder %v3317_v43, 0.0 }
  0xdd   :  { %vm1358_vm1 = vcmp.eq.s32.totalorder %v1066_v57, 1  ;;  %v1063_v26 = vpop.permute.xlu0 %1062  ;;  %1251 = vperm.xlu1 %1714, %v908_v10   ;;  %v3371_v10 = vadd.f32 %v2565_v42, %v267_v4  ;;  %v269_v45 = vmul.f32 %v2573_v11, %v132_v33  ;;  %v133_v57 = vld [vmem:[%s4210_s0 + $0x3a0] sm:$0xff]  ;;  %v597_v52 = vsub.f32 %v4342_v28, %v2565_v42 }
  0xde   :  { %v720_v25 = vmul.f32 %v2355_v60, %v4340_v49  ;;  %v1492_v61 = vsel %vm1358_vm1, %v718_v15, %v3325_v44  ;;  %vm1357_vm3 = vcmp.eq.s32.totalorder %v1063_v26, 1  ;;  %1248 = vperm.xlu0 %1713, %v907_v3   ;;  %v134_v49 = vld [vmem:[%s4210_s0 + $0x3a8] sm:$0xff]  ;;  %v4343_v4 = vsub.f32 %v4328_v48, %v2565_v42 }
  0xdf   :  { %4341 = vst [vmem:[#allocation9_spill] sm:$0xff] %v3371_v10  ;;  %1621 = vst.msk [vmem:[%s4214_s4 + $0x168] sm:$0xff] %vm1575_vm15, %v1492_v61  ;;  %v1491_v15 = vsel %vm1357_vm3, %v717_v22, %v3325_v44  ;;  %v909_v33 = vsel %vm524_vm0, 1, %v4278_v46  ;;  %v722_v26 = vmul.f32 %v2355_v60, %v593_v53  ;;  %vm526_vm4 = vcmp.gt.f32.partialorder %v3355_v21, 0.0 }
  0xe0   :  { %v719_v3 = vmul.f32 %v2355_v60, %v4343_v4  ;;  %1620 = vst.msk [vmem:[%s4214_s4 + $0x160] sm:$0xff] %vm1575_vm15, %v1491_v15  ;;  %v1072_v28 = vpop.permute.xlu1 %1071  ;;  %v3401_v22 = vadd.f32 %v2565_v42, %v266_v1  ;;  %v268_v48 = vmul.f32 %v2573_v11, %v131_v18  ;;  %v912_v4 = vsel %vm527_vm2, 1, %v4278_v46  ;;  %v4346_v18 = vld [vmem:[#allocation13_spill] sm:$0xff] }
  0xe1   :  { %vm1360_vm5 = vcmp.eq.s32.totalorder %v1072_v28, 1  ;;  %v1069_v61 = vpop.permute.xlu0 %1068  ;;  %1257 = vperm.xlu1 %1714, %v910_v5   ;;  %v271_v0 = vmul.f32 %v2573_v11, %v134_v49  ;;  %v270_v15 = vmul.f32 %v2573_v11, %v133_v57  ;;  %vm529_vm7 = vcmp.gt.f32.partialorder %v3371_v10, 0.0  ;;  %v4348_v28 = vld [vmem:[#allocation14_spill] sm:$0xff] }
  0xe2   :  { %4344 = vst [vmem:[#allocation10_spill] sm:$0xff] %v3401_v22  ;;  %v1494_v53 = vsel %vm1360_vm5, %v720_v25, %v3325_v44  ;;  %vm1359_vm6 = vcmp.eq.s32.totalorder %v1069_v61, 1  ;;  %1254 = vperm.xlu0 %1713, %v909_v33   ;;  %v3412_v1 = vadd.f32 %v2565_v42, %v269_v45  ;;  %v596_v5 = vsub.f32 %v4346_v18, %v2565_v42  ;;  %v136_v33 = vld [vmem:[%s4210_s0 + $0x3b8] sm:$0xff]  ;;  %v135_v18 = vld [vmem:[%s4210_s0 + $0x3b0] sm:$0xff] }
  0xe3   :  { %1623 = vst.msk [vmem:[%s4214_s4 + $0x178] sm:$0xff] %vm1575_vm15, %v1494_v53  ;;  %v1493_v49 = vsel %vm1359_vm6, %v719_v3, %v3325_v44  ;;  %v4347_v25 = vsub.f32 %v4334_v39, %v2565_v42  ;;  %v911_v45 = vsel %vm526_vm4, 1, %v4278_v46  ;;  %v599_v61 = vsub.f32 %v4348_v28, %v2565_v42 }
  0xe4   :  { %4345 = vst [vmem:[#allocation11_spill] sm:$0xff] %v3412_v1  ;;  %1622 = vst.msk [vmem:[%s4214_s4 + $0x170] sm:$0xff] %vm1575_vm15, %v1493_v49  ;;  %v1078_v3 = vpop.permute.xlu1 %1077  ;;  %v724_v39 = vmul.f32 %v2355_v60, %v595_v31  ;;  %vm528_vm8 = vcmp.gt.f32.partialorder %v3401_v22, 0.0  ;;  %v3440_v53 = vadd.f32 %v2565_v42, %v268_v48  ;;  %v914_v28 = vsel %vm529_vm7, 1, %v4278_v46 }
  0xe5   :  { %v721_v57 = vmul.f32 %v2355_v60, %v4347_v25  ;;  %vm1362_vm9 = vcmp.eq.s32.totalorder %v1078_v3, 1  ;;  %v1075_v25 = vpop.permute.xlu0 %1074  ;;  %1263 = vperm.xlu1 %1714, %v912_v4   ;;  %v3449_v49 = vadd.f32 %v2565_v42, %v271_v0  ;;  %v3452_v31 = vadd.f32 %v2565_v42, %v270_v15 }
  0xe6   :  { %4349 = vst [vmem:[#allocation12_spill] sm:$0xff] %v3440_v53  ;;  %v1496_v48 = vsel %vm1362_vm9, %v722_v26, %v3325_v44  ;;  %vm1361_vm10 = vcmp.eq.s32.totalorder %v1075_v25, 1  ;;  %1260 = vperm.xlu0 %1713, %v911_v45   ;;  %vm531_vm11 = vcmp.gt.f32.partialorder %v3412_v1, 0.0  ;;  %v273_v3 = vmul.f32 %v2573_v11, %v136_v33  ;;  %v138_v33 = vld [vmem:[%s4210_s0 + $0x3c8] sm:$0xff] }
  0xe7   :  { %4350 = vst [vmem:[#allocation13_spill] sm:$0xff] %v3449_v49  ;;  %4351 = vst [vmem:[#allocation14_spill] sm:$0xff] %v3452_v31  ;;  %v1495_v4 = vsel %vm1361_vm10, %v721_v57, %v3325_v44  ;;  %v4352_v0 = vsub.f32 %v4339_v17, %v2565_v42  ;;  %v913_v26 = vsel %vm528_vm8, 1, %v4278_v46  ;;  %v272_v45 = vmul.f32 %v2573_v11, %v135_v18  ;;  %v4353_v25 = vld [vmem:[#allocation15_spill] sm:$0xff]  ;;  %v137_v11 = vld [vmem:[%s4210_s0 + $0x3c0] sm:$0xff] }
  0xe8   :  { %1625 = vst.msk [vmem:[%s4214_s4 + $0x188] sm:$0xff] %vm1575_vm15, %v1496_v48  ;;  %v598_v48 = vsub.f32 %v4353_v25, %v2565_v42  ;;  %1624 = vst.msk [vmem:[%s4214_s4 + $0x180] sm:$0xff] %vm1575_vm15, %v1495_v4  ;;  %v1084_v17 = vpop.permute.xlu1 %1083  ;;  %v726_v57 = vmul.f32 %v2355_v60, %v597_v52  ;;  %vm530_vm12 = vcmp.gt.f32.partialorder %v3440_v53, 0.0  ;;  %v916_v42 = vsel %vm531_vm11, 1, %v4278_v46 }
  0xe9   :  { %v723_v15 = vmul.f32 %v2355_v60, %v4352_v0  ;;  %v725_v0 = vmul.f32 %v2355_v60, %v596_v5  ;;  %vm1364_vm13 = vcmp.eq.s32.totalorder %v1084_v17, 1  ;;  %v1081_v18 = vpop.permute.xlu0 %1080  ;;  %1269 = vperm.xlu1 %1714, %v914_v28   ;;  %vm533_vm14 = vcmp.gt.f32.partialorder %v3449_v49, 0.0  ;;  %v3494_v5 = vld [vmem:[%s4211_s1] ss:$0 sm:$0xff] }
  0xea   :  { %vm532_vm0 = vcmp.gt.f32.partialorder %v3452_v31, 0.0  ;;  %v1498_v52 = vsel %vm1364_vm13, %v724_v39, %v3325_v44  ;;  %vm1363_vm1 = vcmp.eq.s32.totalorder %v1081_v18, 1  ;;  %1266 = vperm.xlu0 %1713, %v913_v26   ;;  %v3497_v4 = vadd.f32 %v3494_v5, %v273_v3  ;;  %v3502_v28 = vld [vmem:[%s4212_s2] ss:$0 sm:$0xff]  ;;  %v4356_v18 = vld [vmem:[#allocation16_spill] sm:$0xff] }
  0xeb   :  { %v275_v25 = vmul.f32 %v3502_v28, %v138_v33  ;;  %1627 = vst.msk [vmem:[%s4214_s4 + $0x198] sm:$0xff] %vm1575_vm15, %v1498_v52  ;;  %v1497_v39 = vsel %vm1363_vm1, %v723_v15, %v3325_v44  ;;  %v915_v26 = vsel %vm530_vm12, 1, %v4278_v46  ;;  %v3514_v3 = vadd.f32 %v3494_v5, %v272_v45  ;;  %v4357_v33 = vld [vmem:[#allocation17_spill] sm:$0xff] }
  0xec   :  { %4354 = vst [vmem:[#allocation15_spill] sm:$0xff] %v3497_v4  ;;  %v274_v17 = vmul.f32 %v3502_v28, %v137_v11  ;;  %v601_v1 = vsub.f32 %v4356_v18, %v3494_v5  ;;  %v600_v22 = vsub.f32 %v4357_v33, %v3494_v5  ;;  %1626 = vst.msk [vmem:[%s4214_s4 + $0x190] sm:$0xff] %vm1575_vm15, %v1497_v39  ;;  %v1090_v15 = vpop.permute.xlu1 %1089  ;;  %v140_v45 = vld [vmem:[%s4210_s0 + $0x3d8] sm:$0xff]  ;;  %v918_v33 = vsel %vm533_vm14, 1, %v4278_v46 }
  0xed   :  { %4355 = vst [vmem:[#allocation29_spill] sm:$0xff] %v3514_v3  ;;  %v728_v52 = vmul.f32 %v2355_v60, %v599_v61  ;;  %vm1366_vm2 = vcmp.eq.s32.totalorder %v1090_v15, 1  ;;  %v1087_v11 = vpop.permute.xlu0 %1086  ;;  %1275 = vperm.xlu1 %1714, %v916_v42   ;;  %v727_v18 = vmul.f32 %v2355_v60, %v598_v48  ;;  %v917_v39 = vsel %vm532_vm0, 1, %v4278_v46  ;;  %v139_v61 = vld [vmem:[%s4210_s0 + $0x3d0] sm:$0xff] }
  0xee   :  { %v1500_v53 = vsel %vm1366_vm2, %v726_v57, %v3325_v44  ;;  %vm1365_vm3 = vcmp.eq.s32.totalorder %v1087_v11, 1  ;;  %1272 = vperm.xlu0 %1713, %v915_v26   ;;  %vm535_vm4 = vcmp.gt.f32.partialorder %v3497_v4, 0.0  ;;  %v3542_v48 = vadd.f32 %v3494_v5, %v275_v25  ;;  %v4359_v26 = vld [vmem:[#allocation18_spill] sm:$0xff]  ;;  %v4360_v25 = vld [vmem:[#allocation19_spill] sm:$0xff] }
  0xef   :  { %1629 = vst.msk [vmem:[%s4214_s4 + $0x1a8] sm:$0xff] %vm1575_vm15, %v1500_v53  ;;  %v1499_v42 = vsel %vm1365_vm3, %v725_v0, %v3325_v44  ;;  %vm534_vm5 = vcmp.gt.f32.partialorder %v3514_v3, 0.0  ;;  %v3551_v15 = vadd.f32 %v3494_v5, %v274_v17  ;;  %v277_v57 = vmul.f32 %v3502_v28, %v140_v45  ;;  %v142_v17 = vld [vmem:[%s4210_s0 + $0x3e8] sm:$0xff] }
  0xf0   :  { %v603_v11 = vsub.f32 %v4359_v26, %v3494_v5  ;;  %v602_v31 = vsub.f32 %v4360_v25, %v3494_v5  ;;  %1628 = vst.msk [vmem:[%s4214_s4 + $0x1a0] sm:$0xff] %vm1575_vm15, %v1499_v42  ;;  %v1096_v53 = vpop.permute.xlu1 %1095  ;;  %v276_v0 = vmul.f32 %v3502_v28, %v139_v61  ;;  %v730_v26 = vmul.f32 %v2355_v60, %v601_v1  ;;  %v141_v42 = vld [vmem:[%s4210_s0 + $0x3e0] sm:$0xff] }
  0xf1   :  { %4358 = vst [vmem:[#allocation16_spill] sm:$0xff] %v3551_v15  ;;  %vm1368_vm6 = vcmp.eq.s32.totalorder %v1096_v53, 1  ;;  %v1093_v45 = vpop.permute.xlu0 %1092  ;;  %1281 = vperm.xlu1 %1714, %v918_v33   ;;  %v729_v49 = vmul.f32 %v2355_v60, %v600_v22  ;;  %v920_v25 = vsel %vm535_vm4, 1, %v4278_v46  ;;  %v919_v33 = vsel %vm534_vm5, 1, %v4278_v46 }
  0xf2   :  { %v1502_v61 = vsel %vm1368_vm6, %v728_v52, %v3325_v44  ;;  %vm1367_vm7 = vcmp.eq.s32.totalorder %v1093_v45, 1  ;;  %1278 = vperm.xlu0 %1713, %v917_v39   ;;  %vm537_vm8 = vcmp.gt.f32.partialorder %v3542_v48, 0.0  ;;  %vm536_vm9 = vcmp.gt.f32.partialorder %v3551_v15, 0.0  ;;  %v4361_v39 = vld [vmem:[#allocation20_spill] sm:$0xff] }
  0xf3   :  { %1631 = vst.msk [vmem:[%s4214_s4 + $0x1b8] sm:$0xff] %vm1575_vm15, %v1502_v61  ;;  %v1501_v22 = vsel %vm1367_vm7, %v727_v18, %v3325_v44  ;;  %v3586_v1 = vadd.f32 %v3494_v5, %v277_v57  ;;  %v279_v52 = vmul.f32 %v3502_v28, %v142_v17  ;;  %v605_v53 = vsub.f32 %v4361_v39, %v3494_v5  ;;  %v144_v57 = vld [vmem:[%s4210_s0 + $0x3f8] sm:$0xff] }
  0xf4   :  { %1630 = vst.msk [vmem:[%s4214_s4 + $0x1b0] sm:$0xff] %vm1575_vm15, %v1501_v22  ;;  %v1102_v45 = vpop.permute.xlu1 %1101  ;;  %v3596_v61 = vadd.f32 %v3494_v5, %v276_v0  ;;  %v278_v18 = vmul.f32 %v3502_v28, %v141_v42  ;;  %v4362_v17 = vld [vmem:[#allocation21_spill] sm:$0xff]  ;;  %v732_v4 = vmul.f32 %v2355_v60, %v603_v11  ;;  %v731_v22 = vmul.f32 %v2355_v60, %v602_v31  ;;  %v143_v0 = vld [vmem:[%s4210_s0 + $0x3f0] sm:$0xff] }
  0xf5   :  { %v604_v3 = vsub.f32 %v4362_v17, %v3494_v5  ;;  %vm1370_vm10 = vcmp.eq.s32.totalorder %v1102_v45, 1  ;;  %v1099_v39 = vpop.permute.xlu0 %1098  ;;  %1287 = vperm.xlu1 %1714, %v920_v25   ;;  %v922_v10 = vsel %vm537_vm8, 1, %v4278_v46  ;;  %v921_v25 = vsel %vm536_vm9, 1, %v4278_v46  ;;  %v4363_v17 = vld [vmem:[#allocation22_spill] sm:$0xff] }
  0xf6   :  { %v1504_v42 = vsel %vm1370_vm10, %v730_v26, %v3325_v44  ;;  %vm1369_vm11 = vcmp.eq.s32.totalorder %v1099_v39, 1  ;;  %1284 = vperm.xlu0 %1713, %v919_v33   ;;  %vm539_vm12 = vcmp.gt.f32.partialorder %v3586_v1, 0.0  ;;  %v3623_v11 = vadd.f32 %v3494_v5, %v279_v52  ;;  %v4364_v52 = vld [vmem:[#allocation23_spill] sm:$0xff] }
  0xf7   :  { %1633 = vst.msk [vmem:[%s4214_s4 + $0x1c8] sm:$0xff] %vm1575_vm15, %v1504_v42  ;;  %v1503_v31 = vsel %vm1369_vm11, %v729_v49, %v3325_v44  ;;  %v281_v26 = vmul.f32 %v3502_v28, %v144_v57  ;;  %vm538_vm13 = vcmp.gt.f32.partialorder %v3596_v61, 0.0  ;;  %v3632_v45 = vadd.f32 %v3494_v5, %v278_v18 }
  0xf8   :  { %1632 = vst.msk [vmem:[%s4214_s4 + $0x1c0] sm:$0xff] %vm1575_vm15, %v1503_v31  ;;  %v1108_v33 = vpop.permute.xlu1 %1107  ;;  %v280_v49 = vmul.f32 %v3502_v28, %v143_v0  ;;  %v607_v39 = vsub.f32 %v4363_v17, %v3494_v5  ;;  %v606_v42 = vsub.f32 %v4364_v52, %v3494_v5  ;;  %v734_v15 = vmul.f32 %v2355_v60, %v605_v53 }
  0xf9   :  { %vm1372_vm14 = vcmp.eq.s32.totalorder %v1108_v33, 1  ;;  %v1105_v57 = vpop.permute.xlu0 %1104  ;;  %1293 = vperm.xlu1 %1714, %v922_v10   ;;  %v733_v18 = vmul.f32 %v2355_v60, %v604_v3  ;;  %v924_v28 = vsel %vm539_vm12, 1, %v4278_v46  ;;  %v923_v10 = vsel %vm538_vm13, 1, %v4278_v46 }
  0xfa   :  { %v1506_v31 = vsel %vm1372_vm14, %v732_v4, %v3325_v44  ;;  %vm1371_vm0 = vcmp.eq.s32.totalorder %v1105_v57, 1  ;;  %1290 = vperm.xlu0 %1713, %v921_v25   ;;  %vm541_vm1 = vcmp.gt.f32.partialorder %v3623_v11, 0.0  ;;  %v3655_v4 = vadd.f32 %v3494_v5, %v281_v26 }
  0xfb   :  { %1635 = vst.msk [vmem:[%s4214_s4 + $0x1d8] sm:$0xff] %vm1575_vm15, %v1506_v31  ;;  %v1505_v0 = vsel %vm1371_vm0, %v731_v22, %v3325_v44  ;;  %vm540_vm2 = vcmp.gt.f32.partialorder %v3632_v45, 0.0  ;;  %v3663_v53 = vadd.f32 %v3494_v5, %v280_v49  ;;  %v609_v22 = vsub.f32 %v2349_v6, %v3494_v5 }
  0xfc   :  { %1634 = vst.msk [vmem:[%s4214_s4 + $0x1d0] sm:$0xff] %vm1575_vm15, %v1505_v0  ;;  %v1114_v3 = vpop.permute.xlu1 %1113  ;;  %v608_v25 = vsub.f32 %v2363_v14, %v3494_v5  ;;  %v736_v17 = vmul.f32 %v2355_v60, %v607_v39  ;;  %v926_v52 = vsel %vm541_vm1, 1, %v4278_v46  ;;  %v735_v14 = vmul.f32 %v2355_v60, %v606_v42 }
  0xfd   :  { %vm1374_vm3 = vcmp.eq.s32.totalorder %v1114_v3, 1  ;;  %v1111_v26 = vpop.permute.xlu0 %1110  ;;  %1299 = vperm.xlu1 %1714, %v924_v28   ;;  %v925_v49 = vsel %vm540_vm2, 1, %v4278_v46  ;;  %vm543_vm5 = vcmp.gt.f32.partialorder %v3655_v4, 0.0  ;;  %vm542_vm6 = vcmp.gt.f32.partialorder %v3663_v53, 0.0 }
  0xfe   :  { %v1508_v33 = vsel %vm1374_vm3, %v734_v15, %v3325_v44  ;;  %vm1373_vm4 = vcmp.eq.s32.totalorder %v1111_v26, 1  ;;  %1296 = vperm.xlu0 %1713, %v923_v10   ;;  %v611_v39 = vsub.f32 %v2380_v19, %v3494_v5  ;;  %v738_v31 = vmul.f32 %v2355_v60, %v609_v22 }
  0xff   :  { %1637 = vst.msk [vmem:[%s4214_s4 + $0x1e8] sm:$0xff] %vm1575_vm15, %v1508_v33  ;;  %v1507_v6 = vsel %vm1373_vm4, %v733_v18, %v3325_v44  ;;  %v928_v18 = vsel %vm543_vm5, 1, %v4278_v46  ;;  %v610_v28 = vsub.f32 %v2402_v32, %v3494_v5  ;;  %v737_v0 = vmul.f32 %v2355_v60, %v608_v25 }
 0x100   :  { %1636 = vst.msk [vmem:[%s4214_s4 + $0x1e0] sm:$0xff] %vm1575_vm15, %v1507_v6  ;;  %v1120_v15 = vpop.permute.xlu1 %1119  ;;  %v927_v10 = vsel %vm542_vm6, 1, %v4278_v46  ;;  %v613_v32 = vsub.f32 %v2410_v13, %v3494_v5  ;;  %v740_v25 = vmul.f32 %v2355_v60, %v611_v39  ;;  %v612_v46 = vsub.f32 %v2440_v41, %v3494_v5 }
 0x101   :  { %vm1376_vm7 = vcmp.eq.s32.totalorder %v1120_v15, 1  ;;  %v1117_v57 = vpop.permute.xlu0 %1116  ;;  %1305 = vperm.xlu1 %1714, %v926_v52   ;;  %v615_v41 = vsub.f32 %v2453_v30, %v3494_v5 }
 0x102   :  { %v1510_v42 = vsel %vm1376_vm7, %v736_v17, %v3325_v44  ;;  %vm1375_vm8 = vcmp.eq.s32.totalorder %v1117_v57, 1  ;;  %1302 = vperm.xlu0 %1713, %v925_v49   ;;  %v739_v17 = vmul.f32 %v2355_v60, %v610_v28  ;;  %v614_v49 = vsub.f32 %v2478_v54, %v3494_v5 }
 0x103   :  { %1639 = vst.msk [vmem:[%s4214_s4 + $0x1f8] sm:$0xff] %vm1575_vm15, %v1510_v42  ;;  %v1509_v19 = vsel %vm1375_vm8, %v735_v14, %v3325_v44  ;;  %v742_v14 = vmul.f32 %v2355_v60, %v613_v32  ;;  %v741_v39 = vmul.f32 %v2355_v60, %v612_v46  ;;  %v617_v54 = vsub.f32 %v2492_v8, %v3494_v5 }
 0x104   :  { %1638 = vst.msk [vmem:[%s4214_s4 + $0x1f0] sm:$0xff] %vm1575_vm15, %v1509_v19  ;;  %v1126_v3 = vpop.permute.xlu1 %1125 }
 0x105   :  { %vm1378_vm9 = vcmp.eq.s32.totalorder %v1126_v3, 1  ;;  %v1123_v22 = vpop.permute.xlu0 %1122  ;;  %1311 = vperm.xlu1 %1714, %v928_v18   ;;  %v4365_v18 = vld [vmem:[#allocation24_spill] sm:$0xff]  ;;  %v619_v3 = vsub.f32 %v2530_v24, %v3494_v5  ;;  %v746_v32 = vmul.f32 %v2355_v60, %v617_v54 }
 0x106   :  { %v1512_v26 = vsel %vm1378_vm9, %v738_v31, %v3325_v44  ;;  %vm1377_vm10 = vcmp.eq.s32.totalorder %v1123_v22, 1  ;;  %1308 = vperm.xlu0 %1713, %v927_v10   ;;  %v744_v31 = vmul.f32 %v2355_v60, %v615_v41  ;;  %v616_v28 = vsub.f32 %v4365_v18, %v3494_v5 }
 0x107   :  { %1641 = vst.msk [vmem:[%s4214_s4 + $0x208] sm:$0xff] %vm1575_vm15, %v1512_v26  ;;  %v1511_v33 = vsel %vm1377_vm10, %v737_v0, %v3325_v44  ;;  %v743_v0 = vmul.f32 %v2355_v60, %v614_v49  ;;  %v618_v26 = vsub.f32 %v2568_v20, %v3494_v5  ;;  %v621_v20 = vsub.f32 %v2589_v63, %v3494_v5 }
 0x108   :  { %1640 = vst.msk [vmem:[%s4214_s4 + $0x200] sm:$0xff] %vm1575_vm15, %v1511_v33  ;;  %v1132_v13 = vpop.permute.xlu1 %1131  ;;  %v745_v46 = vmul.f32 %v2355_v60, %v616_v28  ;;  %v624_v18 = vsub.f32 %v2705_v2, %v3494_v5  ;;  %v627_v2 = vsub.f32 %v2718_v50, %v3494_v5 }
 0x109   :  { %vm1380_vm11 = vcmp.eq.s32.totalorder %v1132_v13, 1  ;;  %v1129_v52 = vpop.permute.xlu0 %1128  ;;  %v748_v13 = vmul.f32 %v2355_v60, %v619_v3  ;;  %v626_v3 = vsub.f32 %v2746_v9, %v3494_v5  ;;  %v629_v9 = vsub.f32 %v2763_v23, %v3494_v5 }
 0x10a   :  { %v1514_v6 = vsel %vm1380_vm11, %v740_v25, %v3325_v44  ;;  %vm1379_vm12 = vcmp.eq.s32.totalorder %v1129_v52, 1  ;;  %v620_v52 = vsub.f32 %v2617_v29, %v3494_v5  ;;  %v623_v29 = vsub.f32 %v2634_v56, %v3494_v5 }
 0x10b   :  { %1643 = vst.msk [vmem:[%s4214_s4 + $0x218] sm:$0xff] %vm1575_vm15, %v1514_v6  ;;  %v1513_v15 = vsel %vm1379_vm12, %v739_v17, %v3325_v44  ;;  %v747_v6 = vmul.f32 %v2355_v60, %v618_v26 }
 0x10c   :  { %1642 = vst.msk [vmem:[%s4214_s4 + $0x210] sm:$0xff] %vm1575_vm15, %v1513_v15  ;;  %v1138_v30 = vpop.permute.xlu1 %1137  ;;  %v750_v15 = vmul.f32 %v2355_v60, %v621_v20  ;;  %v755_v20 = vmul.f32 %v2355_v60, %v626_v3 }
 0x10d   :  { %vm1382_vm13 = vcmp.eq.s32.totalorder %v1138_v30, 1  ;;  %v1135_v57 = vpop.permute.xlu0 %1134 }
 0x10e   :  { %v1516_v42 = vsel %vm1382_vm13, %v742_v14, %v3325_v44  ;;  %vm1381_vm14 = vcmp.eq.s32.totalorder %v1135_v57, 1  ;;  %v749_v57 = vmul.f32 %v2355_v60, %v620_v52  ;;  %v758_v52 = vmul.f32 %v2355_v60, %v629_v9 }
 0x10f   :  { %1645 = vst.msk [vmem:[%s4214_s4 + $0x228] sm:$0xff] %vm1575_vm15, %v1516_v42  ;;  %v1515_v19 = vsel %vm1381_vm14, %v741_v39, %v3325_v44  ;;  %v622_v39 = vsub.f32 %v2661_v58, %v3494_v5  ;;  %v625_v58 = vsub.f32 %v2672_v36, %v3494_v5 }
 0x110   :  { %1644 = vst.msk [vmem:[%s4214_s4 + $0x220] sm:$0xff] %vm1575_vm15, %v1515_v19  ;;  %v1144_v8 = vpop.permute.xlu1 %1143 }
 0x111   :  { %vm1384_vm0 = vcmp.eq.s32.totalorder %v1144_v8, 1  ;;  %v1141_v10 = vpop.permute.xlu0 %1140  ;;  %v751_v19 = vmul.f32 %v2355_v60, %v622_v39 }
 0x112   :  { %v1518_v22 = vsel %vm1384_vm0, %v744_v31, %v3325_v44  ;;  %vm1383_vm1 = vcmp.eq.s32.totalorder %v1141_v10, 1  ;;  %v752_v31 = vmul.f32 %v2355_v60, %v623_v29  ;;  %v754_v10 = vmul.f32 %v2355_v60, %v625_v58 }
 0x113   :  { %1647 = vst.msk [vmem:[%s4214_s4 + $0x238] sm:$0xff] %vm1575_vm15, %v1518_v22  ;;  %v1517_v25 = vsel %vm1383_vm1, %v743_v0, %v3325_v44  ;;  %v634_v58 = vsub.f32 %v2919_v59, %v3494_v5  ;;  %v637_v59 = vsub.f32 %v2930_v16, %v3494_v5 }
 0x114   :  { %1646 = vst.msk [vmem:[%s4214_s4 + $0x230] sm:$0xff] %vm1575_vm15, %v1517_v25  ;;  %v1150_v24 = vpop.permute.xlu1 %1149 }
 0x115   :  { %vm1386_vm2 = vcmp.eq.s32.totalorder %v1150_v24, 1  ;;  %v1147_v33 = vpop.permute.xlu0 %1146  ;;  %v628_v24 = vsub.f32 %v2790_v27, %v3494_v5  ;;  %v631_v27 = vsub.f32 %v2801_v40, %v3494_v5  ;;  %v766_v3 = vmul.f32 %v2355_v60, %v637_v59 }
 0x116   :  { %v1520_v17 = vsel %vm1386_vm2, %v746_v32, %v3325_v44  ;;  %vm1385_vm3 = vcmp.eq.s32.totalorder %v1147_v33, 1  ;;  %v753_v32 = vmul.f32 %v2355_v60, %v624_v18 }
 0x117   :  { %1649 = vst.msk [vmem:[%s4214_s4 + $0x248] sm:$0xff] %vm1575_vm15, %v1520_v17  ;;  %v1519_v41 = vsel %vm1385_vm3, %v745_v46, %v3325_v44  ;;  %v756_v46 = vmul.f32 %v2355_v60, %v627_v2  ;;  %v763_v2 = vmul.f32 %v2355_v60, %v634_v58  ;;  %v4370_v58 = vld [vmem:[#allocation2_spill] sm:$0xff] }
 0x118   :  { %1648 = vst.msk [vmem:[%s4214_s4 + $0x240] sm:$0xff] %vm1575_vm15, %v1519_v41  ;;  %v1156_v63 = vpop.permute.xlu1 %1155  ;;  %v630_v41 = vsub.f32 %v2834_v37, %v3494_v5  ;;  %v633_v37 = vsub.f32 %v2847_v12, %v3494_v5 }
 0x119   :  { %vm1388_vm4 = vcmp.eq.s32.totalorder %v1156_v63, 1  ;;  %v1153_v14 = vpop.permute.xlu0 %1152  ;;  %v757_v63 = vmul.f32 %v2355_v60, %v628_v24 }
 0x11a   :  { %v1522_v49 = vsel %vm1388_vm4, %v748_v13, %v3325_v44  ;;  %vm1387_vm5 = vcmp.eq.s32.totalorder %v1153_v14, 1 }
 0x11b   :  { %1651 = vst.msk [vmem:[%s4214_s4 + $0x258] sm:$0xff] %vm1575_vm15, %v1522_v49  ;;  %v1521_v30 = vsel %vm1387_vm5, %v747_v6, %v3325_v44  ;;  %v760_v49 = vmul.f32 %v2355_v60, %v631_v27  ;;  %v4366_v27 = vld [vmem:[#allocation25_spill] sm:$0xff] }
 0x11c   :  { %1650 = vst.msk [vmem:[%s4214_s4 + $0x250] sm:$0xff] %vm1575_vm15, %v1521_v30  ;;  %v1162_v56 = vpop.permute.xlu1 %1161  ;;  %v759_v30 = vmul.f32 %v2355_v60, %v630_v41 }
 0x11d   :  { %vm1390_vm6 = vcmp.eq.s32.totalorder %v1162_v56, 1  ;;  %v1159_v54 = vpop.permute.xlu0 %1158 }
 0x11e   :  { %v1524_v42 = vsel %vm1390_vm6, %v750_v15, %v3325_v44  ;;  %vm1389_vm7 = vcmp.eq.s32.totalorder %v1159_v54, 1  ;;  %v632_v15 = vsub.f32 %v2875_v51, %v3494_v5  ;;  %v635_v51 = vsub.f32 %v2892_v55, %v3494_v5 }
 0x11f   :  { %1653 = vst.msk [vmem:[%s4214_s4 + $0x268] sm:$0xff] %vm1575_vm15, %v1524_v42  ;;  %v1523_v28 = vsel %vm1389_vm7, %v749_v57, %v3325_v44  ;;  %v762_v54 = vmul.f32 %v2355_v60, %v633_v37 }
 0x120   :  { %1652 = vst.msk [vmem:[%s4214_s4 + $0x260] sm:$0xff] %vm1575_vm15, %v1523_v28  ;;  %v1168_v36 = vpop.permute.xlu1 %1167 }
 0x121   :  { %vm1392_vm8 = vcmp.eq.s32.totalorder %v1168_v36, 1  ;;  %v1165_v0 = vpop.permute.xlu0 %1164  ;;  %v636_v36 = vsub.f32 %v2963_v7, %v3494_v5  ;;  %v639_v7 = vsub.f32 %v2976_v47, %v3494_v5 }
 0x122   :  { %v1526_v8 = vsel %vm1392_vm8, %v752_v31, %v3325_v44  ;;  %vm1391_vm9 = vcmp.eq.s32.totalorder %v1165_v0, 1  ;;  %v761_v31 = vmul.f32 %v2355_v60, %v632_v15 }
 0x123   :  { %1655 = vst.msk [vmem:[%s4214_s4 + $0x278] sm:$0xff] %vm1575_vm15, %v1526_v8  ;;  %v1525_v22 = vsel %vm1391_vm9, %v751_v19, %v3325_v44  ;;  %v764_v19 = vmul.f32 %v2355_v60, %v635_v51 }
 0x124   :  { %1654 = vst.msk [vmem:[%s4214_s4 + $0x270] sm:$0xff] %vm1575_vm15, %v1525_v22  ;;  %v1174_v50 = vpop.permute.xlu1 %1173  ;;  %v638_v22 = vsub.f32 %v3004_v35, %v3494_v5  ;;  %v641_v35 = vsub.f32 %v3021_v34, %v3494_v5 }
 0x125   :  { %vm1394_vm10 = vcmp.eq.s32.totalorder %v1174_v50, 1  ;;  %v1171_v26 = vpop.permute.xlu0 %1170  ;;  %v765_v50 = vmul.f32 %v2355_v60, %v636_v36 }
 0x126   :  { %v1528_v25 = vsel %vm1394_vm10, %v754_v10, %v3325_v44  ;;  %vm1393_vm11 = vcmp.eq.s32.totalorder %v1171_v26, 1 }
 0x127   :  { %1657 = vst.msk [vmem:[%s4214_s4 + $0x288] sm:$0xff] %vm1575_vm15, %v1528_v25  ;;  %v1527_v33 = vsel %vm1393_vm11, %v753_v32, %v3325_v44  ;;  %v768_v25 = vmul.f32 %v2355_v60, %v639_v7 }
 0x128   :  { %1656 = vst.msk [vmem:[%s4214_s4 + $0x280] sm:$0xff] %vm1575_vm15, %v1527_v33  ;;  %v1180_v23 = vpop.permute.xlu1 %1179  ;;  %v767_v33 = vmul.f32 %v2355_v60, %v638_v22  ;;  %v4373_v22 = vld [vmem:[#allocation5_spill] sm:$0xff] }
 0x129   :  { %vm1396_vm12 = vcmp.eq.s32.totalorder %v1180_v23, 1  ;;  %v1177_v17 = vpop.permute.xlu0 %1176 }
 0x12a   :  { %v1530_v13 = vsel %vm1396_vm12, %v756_v46, %v3325_v44  ;;  %vm1395_vm13 = vcmp.eq.s32.totalorder %v1177_v17, 1  ;;  %v640_v46 = vsub.f32 %v3048_v38, %v3494_v5  ;;  %v643_v38 = vsub.f32 %v3059_v62, %v3494_v5 }
 0x12b   :  { %1659 = vst.msk [vmem:[%s4214_s4 + $0x298] sm:$0xff] %vm1575_vm15, %v1530_v13  ;;  %v1529_v6 = vsel %vm1395_vm13, %v755_v20, %v3325_v44  ;;  %v770_v17 = vmul.f32 %v2355_v60, %v641_v35  ;;  %v642_v13 = vsub.f32 %v4366_v27, %v3494_v5 }
 0x12c   :  { %1658 = vst.msk [vmem:[%s4214_s4 + $0x290] sm:$0xff] %vm1575_vm15, %v1529_v6  ;;  %v1186_v40 = vpop.permute.xlu1 %1185  ;;  %v769_v41 = vmul.f32 %v2355_v60, %v640_v46  ;;  %v772_v37 = vmul.f32 %v2355_v60, %v643_v38 }
 0x12d   :  { %vm1398_vm14 = vcmp.eq.s32.totalorder %v1186_v40, 1  ;;  %v1183_v14 = vpop.permute.xlu0 %1182 }
 0x12e   :  { %v1532_v29 = vsel %vm1398_vm14, %v758_v52, %v3325_v44  ;;  %vm1397_vm0 = vcmp.eq.s32.totalorder %v1183_v14, 1 }
 0x12f   :  { %1661 = vst.msk [vmem:[%s4214_s4 + $0x2a8] sm:$0xff] %vm1575_vm15, %v1532_v29  ;;  %v1531_v39 = vsel %vm1397_vm0, %v757_v63, %v3325_v44  ;;  %v4367_v63 = vld [vmem:[#allocation26_spill] sm:$0xff]  ;;  %v4368_v29 = vld [vmem:[#allocation27_spill] sm:$0xff] }
 0x130   :  { %1660 = vst.msk [vmem:[%s4214_s4 + $0x2a0] sm:$0xff] %vm1575_vm15, %v1531_v39  ;;  %v1192_v12 = vpop.permute.xlu1 %1191  ;;  %v645_v40 = vsub.f32 %v4367_v63, %v3494_v5  ;;  %v771_v39 = vmul.f32 %v2355_v60, %v642_v13 }
 0x131   :  { %vm1400_vm1 = vcmp.eq.s32.totalorder %v1192_v12, 1  ;;  %v1189_v57 = vpop.permute.xlu0 %1188 }
 0x132   :  { %v1534_v56 = vsel %vm1400_vm1, %v760_v49, %v3325_v44  ;;  %vm1399_vm2 = vcmp.eq.s32.totalorder %v1189_v57, 1  ;;  %v644_v49 = vsub.f32 %v4368_v29, %v3494_v5  ;;  %v4369_v57 = vld [vmem:[#allocation28_spill] sm:$0xff] }
 0x133   :  { %1663 = vst.msk [vmem:[%s4214_s4 + $0x2b8] sm:$0xff] %vm1575_vm15, %v1534_v56  ;;  %v1533_v42 = vsel %vm1399_vm2, %v759_v30, %v3325_v44  ;;  %v647_v51 = vsub.f32 %v4369_v57, %v3494_v5 }
 0x134   :  { %1662 = vst.msk [vmem:[%s4214_s4 + $0x2b0] sm:$0xff] %vm1575_vm15, %v1533_v42  ;;  %v1198_v55 = vpop.permute.xlu1 %1197  ;;  %v646_v42 = vsub.f32 %v4370_v58, %v3494_v5  ;;  %v4379_v58 = vld [vmem:[#allocation11_spill] sm:$0xff] }
 0x135   :  { %vm1402_vm3 = vcmp.eq.s32.totalorder %v1198_v55, 1  ;;  %v1195_v18 = vpop.permute.xlu0 %1194  ;;  %v773_v55 = vmul.f32 %v2355_v60, %v644_v49  ;;  %v4377_v49 = vld [vmem:[#allocation9_spill] sm:$0xff] }
 0x136   :  { %v1536_v28 = vsel %vm1402_vm3, %v762_v54, %v3325_v44  ;;  %vm1401_vm4 = vcmp.eq.s32.totalorder %v1195_v18, 1  ;;  %v774_v54 = vmul.f32 %v2355_v60, %v645_v40  ;;  %v775_v7 = vmul.f32 %v2355_v60, %v646_v42 }
 0x137   :  { %1665 = vst.msk [vmem:[%s4214_s4 + $0x2c8] sm:$0xff] %vm1575_vm15, %v1536_v28  ;;  %v1535_v0 = vsel %vm1401_vm4, %v761_v31, %v3325_v44  ;;  %v4371_v28 = vld [vmem:[#allocation3_spill] sm:$0xff]  ;;  %v654_v40 = vsub.f32 %v3355_v21, %v3494_v5  ;;  %v657_v21 = vsub.f32 %v4377_v49, %v3494_v5  ;;  %v659_v42 = vsub.f32 %v4379_v58, %v3494_v5 }
 0x138   :  { %1664 = vst.msk [vmem:[%s4214_s4 + $0x2c0] sm:$0xff] %vm1575_vm15, %v1535_v0  ;;  %v1204_v16 = vpop.permute.xlu1 %1203  ;;  %v776_v0 = vmul.f32 %v2355_v60, %v647_v51 }
 0x139   :  { %vm1404_vm5 = vcmp.eq.s32.totalorder %v1204_v16, 1  ;;  %v1201_v8 = vpop.permute.xlu0 %1200  ;;  %v783_v51 = vmul.f32 %v2355_v60, %v654_v40 }
 0x13a   :  { %v1538_v10 = vsel %vm1404_vm5, %v764_v19, %v3325_v44  ;;  %vm1403_vm6 = vcmp.eq.s32.totalorder %v1201_v8, 1  ;;  %v649_v19 = vsub.f32 %v4371_v28, %v3494_v5 }
 0x13b   :  { %1667 = vst.msk [vmem:[%s4214_s4 + $0x2d8] sm:$0xff] %vm1575_vm15, %v1538_v10  ;;  %v1537_v32 = vsel %vm1403_vm6, %v763_v2, %v3325_v44  ;;  %v4372_v2 = vld [vmem:[#allocation4_spill] sm:$0xff] }
 0x13c   :  { %1666 = vst.msk [vmem:[%s4214_s4 + $0x2d0] sm:$0xff] %vm1575_vm15, %v1537_v32  ;;  %v1210_v47 = vpop.permute.xlu1 %1209  ;;  %v648_v16 = vsub.f32 %v4372_v2, %v3494_v5  ;;  %v651_v32 = vsub.f32 %v4373_v22, %v3494_v5  ;;  %v4381_v2 = vld [vmem:[#allocation13_spill] sm:$0xff] }
 0x13d   :  { %vm1406_vm7 = vcmp.eq.s32.totalorder %v1210_v47, 1  ;;  %v1207_v26 = vpop.permute.xlu0 %1206  ;;  %v778_v47 = vmul.f32 %v2355_v60, %v649_v19 }
 0x13e   :  { %v1540_v9 = vsel %vm1406_vm7, %v766_v3, %v3325_v44  ;;  %vm1405_vm8 = vcmp.eq.s32.totalorder %v1207_v26, 1  ;;  %v4374_v26 = vld [vmem:[#allocation6_spill] sm:$0xff]  ;;  %v780_v38 = vmul.f32 %v2355_v60, %v651_v32 }
 0x13f   :  { %1669 = vst.msk [vmem:[%s4214_s4 + $0x2e8] sm:$0xff] %vm1575_vm15, %v1540_v9  ;;  %v1539_v24 = vsel %vm1405_vm8, %v765_v50, %v3325_v44  ;;  %v650_v35 = vsub.f32 %v4374_v26, %v3494_v5  ;;  %v4383_v26 = vld [vmem:[#allocation15_spill] sm:$0xff] }
 0x140   :  { %1668 = vst.msk [vmem:[%s4214_s4 + $0x2e0] sm:$0xff] %vm1575_vm15, %v1539_v24  ;;  %v1216_v34 = vpop.permute.xlu1 %1215 }
 0x141   :  { %vm1408_vm9 = vcmp.eq.s32.totalorder %v1216_v34, 1  ;;  %v1213_v20 = vpop.permute.xlu0 %1212  ;;  %v779_v13 = vmul.f32 %v2355_v60, %v650_v35  ;;  %v663_v35 = vsub.f32 %v4383_v26, %v3494_v5 }
 0x142   :  { %v1542_v23 = vsel %vm1408_vm9, %v768_v25, %v3325_v44  ;;  %vm1407_vm10 = vcmp.eq.s32.totalorder %v1213_v20, 1  ;;  %v777_v25 = vmul.f32 %v2355_v60, %v648_v16  ;;  %v661_v16 = vsub.f32 %v4381_v2, %v3494_v5 }
 0x143   :  { %1671 = vst.msk [vmem:[%s4214_s4 + $0x2f8] sm:$0xff] %vm1575_vm15, %v1542_v23  ;;  %v1541_v52 = vsel %vm1407_vm10, %v767_v33, %v3325_v44  ;;  %v4375_v33 = vld [vmem:[#allocation7_spill] sm:$0xff]  ;;  %v4376_v23 = vld [vmem:[#allocation8_spill] sm:$0xff] }
 0x144   :  { %1670 = vst.msk [vmem:[%s4214_s4 + $0x2f0] sm:$0xff] %vm1575_vm15, %v1541_v52  ;;  %v1222_v62 = vpop.permute.xlu1 %1221  ;;  %v653_v34 = vsub.f32 %v4375_v33, %v3494_v5 }
 0x145   :  { %vm1410_vm11 = vcmp.eq.s32.totalorder %v1222_v62, 1  ;;  %v1219_v6 = vpop.permute.xlu0 %1218  ;;  %v655_v62 = vsub.f32 %v3317_v43, %v3494_v5 }
 0x146   :  { %v1544_v14 = vsel %vm1410_vm11, %v770_v17, %v3325_v44  ;;  %vm1409_vm12 = vcmp.eq.s32.totalorder %v1219_v6, 1  ;;  %v652_v17 = vsub.f32 %v4376_v23, %v3494_v5  ;;  %v782_v63 = vmul.f32 %v2355_v60, %v653_v34 }
 0x147   :  { %1673 = vst.msk [vmem:[%s4214_s4 + $0x308] sm:$0xff] %vm1575_vm15, %v1544_v14  ;;  %v1543_v15 = vsel %vm1409_vm12, %v769_v41, %v3325_v44  ;;  %v665_v23 = vsub.f32 %v3542_v48, %v3494_v5 }
 0x148   :  { %1672 = vst.msk [vmem:[%s4214_s4 + $0x300] sm:$0xff] %vm1575_vm15, %v1543_v15  ;;  %v1228_v30 = vpop.permute.xlu1 %1227 }
 0x149   :  { %vm1412_vm13 = vcmp.eq.s32.totalorder %v1228_v30, 1  ;;  %v1225_v12 = vpop.permute.xlu0 %1224  ;;  %v4378_v30 = vld [vmem:[#allocation10_spill] sm:$0xff] }
 0x14a   :  { %v1546_v56 = vsel %vm1412_vm13, %v772_v37, %v3325_v44  ;;  %vm1411_vm14 = vcmp.eq.s32.totalorder %v1225_v12, 1  ;;  %v781_v37 = vmul.f32 %v2355_v60, %v652_v17  ;;  %v656_v12 = vsub.f32 %v4378_v30, %v3494_v5 }
 0x14b   :  { %1675 = vst.msk [vmem:[%s4214_s4 + $0x318] sm:$0xff] %vm1575_vm15, %v1546_v56  ;;  %v1545_v31 = vsel %vm1411_vm14, %v771_v39, %v3325_v44  ;;  %v784_v39 = vmul.f32 %v2355_v60, %v655_v62 }
 0x14c   :  { %1674 = vst.msk [vmem:[%s4214_s4 + $0x310] sm:$0xff] %vm1575_vm15, %v1545_v31  ;;  %v1234_v18 = vpop.permute.xlu1 %1233  ;;  %v4076_v31 = vld [vmem:[%s4213_s3] ss:$0 sm:$0xff]  ;;  %v785_v19 = vmul.f32 %v2355_v60, %v656_v12 }
 0x14d   :  { %vm1414_vm0 = vcmp.eq.s32.totalorder %v1234_v18, 1  ;;  %v1231_v59 = vpop.permute.xlu0 %1230  ;;  %v4380_v18 = vld [vmem:[#allocation12_spill] sm:$0xff] }
 0x14e   :  { %v1548_v36 = vsel %vm1414_vm0, %v774_v54, %v3325_v44  ;;  %vm1413_vm1 = vcmp.eq.s32.totalorder %v1231_v59, 1  ;;  %v658_v59 = vsub.f32 %v4380_v18, %v3494_v5 }
 0x14f   :  { %1677 = vst.msk [vmem:[%s4214_s4 + $0x328] sm:$0xff] %vm1575_vm15, %v1548_v36  ;;  %v1547_v8 = vsel %vm1413_vm1, %v773_v55, %v3325_v44  ;;  %v786_v55 = vmul.f32 %v2355_v60, %v657_v21 }
 0x150   :  { %1676 = vst.msk [vmem:[%s4214_s4 + $0x320] sm:$0xff] %vm1575_vm15, %v1547_v8  ;;  %v1240_v10 = vpop.permute.xlu1 %1239  ;;  %v787_v32 = vmul.f32 %v2355_v60, %v658_v59 }
 0x151   :  { %vm1416_vm2 = vcmp.eq.s32.totalorder %v1240_v10, 1  ;;  %v1237_v3 = vpop.permute.xlu0 %1236  ;;  %v4382_v10 = vld [vmem:[#allocation14_spill] sm:$0xff] }
 0x152   :  { %v1550_v50 = vsel %vm1416_vm2, %v776_v0, %v3325_v44  ;;  %vm1415_vm3 = vcmp.eq.s32.totalorder %v1237_v3, 1  ;;  %v660_v3 = vsub.f32 %v4382_v10, %v3494_v5 }
 0x153   :  { %1679 = vst.msk [vmem:[%s4214_s4 + $0x338] sm:$0xff] %vm1575_vm15, %v1550_v50  ;;  %v1549_v9 = vsel %vm1415_vm3, %v775_v7, %v3325_v44  ;;  %v788_v7 = vmul.f32 %v2355_v60, %v659_v42  ;;  %v670_v42 = vsub.f32 %v3663_v53, %v3494_v5 }
 0x154   :  { %1678 = vst.msk [vmem:[%s4214_s4 + $0x330] sm:$0xff] %vm1575_vm15, %v1549_v9  ;;  %v1246_v46 = vpop.permute.xlu1 %1245  ;;  %v789_v34 = vmul.f32 %v2355_v60, %v660_v3 }
 0x155   :  { %vm1418_vm4 = vcmp.eq.s32.totalorder %v1246_v46, 1  ;;  %v1243_v24 = vpop.permute.xlu0 %1242  ;;  %v4384_v46 = vld [vmem:[#allocation29_spill] sm:$0xff]  ;;  %v799_v53 = vmul.f32 %v2355_v60, %v670_v42 }
 0x156   :  { %v1552_v20 = vsel %vm1418_vm4, %v778_v47, %v3325_v44  ;;  %vm1417_vm5 = vcmp.eq.s32.totalorder %v1243_v24, 1  ;;  %v662_v24 = vsub.f32 %v4384_v46, %v3494_v5 }
 0x157   :  { %1681 = vst.msk [vmem:[%s4214_s4 + $0x348] sm:$0xff] %vm1575_vm15, %v1552_v20  ;;  %v1551_v27 = vsel %vm1417_vm5, %v777_v25, %v3325_v44  ;;  %v790_v25 = vmul.f32 %v2355_v60, %v661_v16 }
 0x158   :  { %1680 = vst.msk [vmem:[%s4214_s4 + $0x340] sm:$0xff] %vm1575_vm15, %v1551_v27  ;;  %v1252_v52 = vpop.permute.xlu1 %1251  ;;  %v792_v27 = vmul.f32 %v2355_v60, %v663_v35  ;;  %v791_v62 = vmul.f32 %v2355_v60, %v662_v24 }
 0x159   :  { %vm1420_vm6 = vcmp.eq.s32.totalorder %v1252_v52, 1  ;;  %v1249_v41 = vpop.permute.xlu0 %1248 }
 0x15a   :  { %v1554_v6 = vsel %vm1420_vm6, %v780_v38, %v3325_v44  ;;  %vm1419_vm7 = vcmp.eq.s32.totalorder %v1249_v41, 1 }
 0x15b   :  { %1683 = vst.msk [vmem:[%s4214_s4 + $0x358] sm:$0xff] %vm1575_vm15, %v1554_v6  ;;  %v1553_v14 = vsel %vm1419_vm7, %v779_v13, %v3325_v44  ;;  %v4385_v13 = vld [vmem:[#allocation16_spill] sm:$0xff] }
 0x15c   :  { %1682 = vst.msk [vmem:[%s4214_s4 + $0x350] sm:$0xff] %vm1575_vm15, %v1553_v14  ;;  %v1258_v43 = vpop.permute.xlu1 %1257  ;;  %v664_v52 = vsub.f32 %v4385_v13, %v3494_v5  ;;  %v794_v14 = vmul.f32 %v2355_v60, %v665_v23 }
 0x15d   :  { %vm1422_vm8 = vcmp.eq.s32.totalorder %v1258_v43, 1  ;;  %v1255_v29 = vpop.permute.xlu0 %1254 }
 0x15e   :  { %v1556_v15 = vsel %vm1422_vm8, %v782_v63, %v3325_v44  ;;  %vm1421_vm9 = vcmp.eq.s32.totalorder %v1255_v29, 1  ;;  %v667_v63 = vsub.f32 %v3586_v1, %v3494_v5  ;;  %v793_v29 = vmul.f32 %v2355_v60, %v664_v52 }
 0x15f   :  { %1685 = vst.msk [vmem:[%s4214_s4 + $0x368] sm:$0xff] %vm1575_vm15, %v1556_v15  ;;  %v1555_v57 = vsel %vm1421_vm9, %v781_v37, %v3325_v44  ;;  %v666_v37 = vsub.f32 %v3596_v61, %v3494_v5  ;;  %v669_v61 = vsub.f32 %v3623_v11, %v3494_v5 }
 0x160   :  { %1684 = vst.msk [vmem:[%s4214_s4 + $0x360] sm:$0xff] %vm1575_vm15, %v1555_v57  ;;  %v1264_v56 = vpop.permute.xlu1 %1263  ;;  %v796_v15 = vmul.f32 %v2355_v60, %v667_v63 }
 0x161   :  { %vm1424_vm10 = vcmp.eq.s32.totalorder %v1264_v56, 1  ;;  %v1261_v54 = vpop.permute.xlu0 %1260  ;;  %v795_v12 = vmul.f32 %v2355_v60, %v666_v37  ;;  %v671_v56 = vsub.f32 %v3655_v4, %v3494_v5 }
 0x162   :  { %v1558_v44 = vsel %vm1424_vm10, %v784_v39, %v4076_v31  ;;  %vm1423_vm11 = vcmp.eq.s32.totalorder %v1261_v54, 1  ;;  %v668_v39 = vsub.f32 %v3632_v45, %v3494_v5  ;;  %v798_v45 = vmul.f32 %v2355_v60, %v669_v61 }
 0x163   :  { %1687 = vst.msk [vmem:[%s4214_s4 + $0x378] sm:$0xff] %vm1575_vm15, %v1558_v44  ;;  %v1557_v28 = vsel %vm1423_vm11, %v783_v51, %v4076_v31  ;;  %v800_v18 = vmul.f32 %v2355_v60, %v671_v56 }
 0x164   :  { %1686 = vst.msk [vmem:[%s4214_s4 + $0x370] sm:$0xff] %vm1575_vm15, %v1557_v28  ;;  %v1270_v36 = vpop.permute.xlu1 %1269  ;;  %v797_v58 = vmul.f32 %v2355_v60, %v668_v39 }
 0x165   :  { %vm1426_vm12 = vcmp.eq.s32.totalorder %v1270_v36, 1  ;;  %v1267_v0 = vpop.permute.xlu0 %1266 }
 0x166   :  { %v1560_v8 = vsel %vm1426_vm12, %v786_v55, %v4076_v31  ;;  %vm1425_vm13 = vcmp.eq.s32.totalorder %v1267_v0, 1 }
 0x167   :  { %1689 = vst.msk [vmem:[%s4214_s4 + $0x388] sm:$0xff] %vm1575_vm15, %v1560_v8  ;;  %v1559_v22 = vsel %vm1425_vm13, %v785_v19, %v4076_v31 }
 0x168   :  { %1688 = vst.msk [vmem:[%s4214_s4 + $0x380] sm:$0xff] %vm1575_vm15, %v1559_v22  ;;  %v1276_v50 = vpop.permute.xlu1 %1275 }
 0x169   :  { %vm1428_vm14 = vcmp.eq.s32.totalorder %v1276_v50, 1  ;;  %v1273_v47 = vpop.permute.xlu0 %1272 }
 0x16a   :  { %v1562_v9 = vsel %vm1428_vm14, %v788_v7, %v4076_v31  ;;  %vm1427_vm0 = vcmp.eq.s32.totalorder %v1273_v47, 1 }
 0x16b   :  { %1691 = vst.msk [vmem:[%s4214_s4 + $0x398] sm:$0xff] %vm1575_vm15, %v1562_v9  ;;  %v1561_v33 = vsel %vm1427_vm0, %v787_v32, %v4076_v31 }
 0x16c   :  { %1690 = vst.msk [vmem:[%s4214_s4 + $0x390] sm:$0xff] %vm1575_vm15, %v1561_v33  ;;  %v1282_v20 = vpop.permute.xlu1 %1281 }
 0x16d   :  { %vm1430_vm1 = vcmp.eq.s32.totalorder %v1282_v20, 1  ;;  %v1279_v38 = vpop.permute.xlu0 %1278 }
 0x16e   :  { %v1564_v17 = vsel %vm1430_vm1, %v790_v25, %v4076_v31  ;;  %vm1429_vm2 = vcmp.eq.s32.totalorder %v1279_v38, 1 }
 0x16f   :  { %1693 = vst.msk [vmem:[%s4214_s4 + $0x3a8] sm:$0xff] %vm1575_vm15, %v1564_v17  ;;  %v1563_v41 = vsel %vm1429_vm2, %v789_v34, %v4076_v31 }
 0x170   :  { %1692 = vst.msk [vmem:[%s4214_s4 + $0x3a0] sm:$0xff] %vm1575_vm15, %v1563_v41  ;;  %v1288_v48 = vpop.permute.xlu1 %1287 }
 0x171   :  { %vm1432_vm3 = vcmp.eq.s32.totalorder %v1288_v48, 1  ;;  %v1285_v6 = vpop.permute.xlu0 %1284 }
 0x172   :  { %v1566_v40 = vsel %vm1432_vm3, %v792_v27, %v4076_v31  ;;  %vm1431_vm4 = vcmp.eq.s32.totalorder %v1285_v6, 1 }
 0x173   :  { %1695 = vst.msk [vmem:[%s4214_s4 + $0x3b8] sm:$0xff] %vm1575_vm15, %v1566_v40  ;;  %v1565_v43 = vsel %vm1431_vm4, %v791_v62, %v4076_v31 }
 0x174   :  { %1694 = vst.msk [vmem:[%s4214_s4 + $0x3b0] sm:$0xff] %vm1575_vm15, %v1565_v43  ;;  %v1294_v1 = vpop.permute.xlu1 %1293 }
 0x175   :  { %vm1434_vm5 = vcmp.eq.s32.totalorder %v1294_v1, 1  ;;  %v1291_v49 = vpop.permute.xlu0 %1290 }
 0x176   :  { %v1568_v21 = vsel %vm1434_vm5, %v794_v14, %v4076_v31  ;;  %vm1433_vm6 = vcmp.eq.s32.totalorder %v1291_v49, 1 }
 0x177   :  { %1697 = vst.msk [vmem:[%s4214_s4 + $0x3c8] sm:$0xff] %vm1575_vm15, %v1568_v21  ;;  %v1567_v30 = vsel %vm1433_vm6, %v793_v29, %v4076_v31 }
 0x178   :  { %1696 = vst.msk [vmem:[%s4214_s4 + $0x3c0] sm:$0xff] %vm1575_vm15, %v1567_v30  ;;  %v1300_v11 = vpop.permute.xlu1 %1299 }
 0x179   :  { %vm1436_vm7 = vcmp.eq.s32.totalorder %v1300_v11, 1  ;;  %v1297_v57 = vpop.permute.xlu0 %1296 }
 0x17a   :  { %v1570_v51 = vsel %vm1436_vm7, %v796_v15, %v4076_v31  ;;  %vm1435_vm8 = vcmp.eq.s32.totalorder %v1297_v57, 1 }
 0x17b   :  { %1699 = vst.msk [vmem:[%s4214_s4 + $0x3d8] sm:$0xff] %vm1575_vm15, %v1570_v51  ;;  %v1569_v54 = vsel %vm1435_vm8, %v795_v12, %v4076_v31 }
 0x17c   :  { %1698 = vst.msk [vmem:[%s4214_s4 + $0x3d0] sm:$0xff] %vm1575_vm15, %v1569_v54  ;;  %v1306_v44 = vpop.permute.xlu1 %1305 }
 0x17d   :  { %vm1438_vm9 = vcmp.eq.s32.totalorder %v1306_v44, 1  ;;  %v1303_v4 = vpop.permute.xlu0 %1302 }
 0x17e   :  { %v1572_v55 = vsel %vm1438_vm9, %v798_v45, %v4076_v31  ;;  %vm1437_vm10 = vcmp.eq.s32.totalorder %v1303_v4, 1 }
 0x17f   :  { %1701 = vst.msk [vmem:[%s4214_s4 + $0x3e8] sm:$0xff] %vm1575_vm15, %v1572_v55  ;;  %v1571_v5 = vsel %vm1437_vm10, %v797_v58, %v4076_v31 }
 0x180   :  { %1700 = vst.msk [vmem:[%s4214_s4 + $0x3e0] sm:$0xff] %vm1575_vm15, %v1571_v5  ;;  %v1312_v59 = vpop.permute.xlu1 %1311 }
 0x181   :  { %vm1440_vm11 = vcmp.eq.s32.totalorder %v1312_v59, 1  ;;  %v1309_v28 = vpop.permute.xlu0 %1308 }
 0x182   :  { %v1574_v19 = vsel %vm1440_vm11, %v800_v18, %v4076_v31  ;;  %vm1439_vm12 = vcmp.eq.s32.totalorder %v1309_v28, 1 }
 0x183   :  { %1703 = vst.msk [vmem:[%s4214_s4 + $0x3f8] sm:$0xff] %vm1575_vm15, %v1574_v19  ;;  %v1573_v36 = vsel %vm1439_vm12, %v799_v53, %v4076_v31 }
 0x184   :  { %1702 = vst.msk [vmem:[%s4214_s4 + $0x3f0] sm:$0xff] %vm1575_vm15, %v1573_v36 }

</bundles_post_ra>
